<compile_context>
chip_gen: v5e
topology: v5e:2x2
jax: 0.10.0
libtpu: 0.0.40
codegen_flags: <defaults>
</compile_context>

<pallas_src>
import jax
import jax.numpy as jnp
import numpy as np
from jax.experimental import pallas as pl
from jax.experimental.pallas import tpu as pltpu


def gru_value_decoder_kernel(embs_ref, h0_ref, mem_ref, mask_ref,
                             wih_ref, whh_ref, gib_ref, ghb_ref,
                             wc_ref, wq_ref, wval_ref, bval_ref,
                             out_ref):
    T, Bt, E = embs_ref.shape
    H = h0_ref.shape[-1]
    Hp = whh_ref.shape[-1] // 3          # lane-padded per-gate width (multiple of 128)

    # ---- Hoisted input projection: one fused [T*Bt, E] x [E, 3*Hp] MXU call, biases fused.
    #      Time-major layout so gi[t] below is a free leading-dim slice (no sublane gather). ----
    x = embs_ref[...].reshape(T * Bt, E).astype(jnp.bfloat16)
    gi = jnp.dot(x, wih_ref[...], preferred_element_type=jnp.float32) + gib_ref[...]
    gi = gi.reshape(T, Bt, 3 * Hp)                                       # [T, Bt, 3Hp]

    whh = whh_ref[...]                                                   # hoisted: loaded once
    ghb = ghb_ref[...]                                                   # hoisted: b_hn slab (r/z zero)
    h = h0_ref[...]                                                      # [Bt, H] f32

    # ---- GRU recurrence (fully unrolled, PyTorch gate order r, z, n). One fused matmul/step. ----
    hs = []
    for t in range(T):
        gh = jnp.dot(h, whh, preferred_element_type=jnp.float32) + ghb   # [Bt, 3Hp]
        gi_t = gi[t]                                                     # [Bt, 3Hp]
        r = jax.nn.sigmoid(gi_t[:, 0:H] + gh[:, 0:H])
        z = jax.nn.sigmoid(gi_t[:, Hp:Hp + H] + gh[:, Hp:Hp + H])
        n = jnp.tanh(gi_t[:, 2 * Hp:2 * Hp + H] + r * gh[:, 2 * Hp:2 * Hp + H])
        h = (1.0 - z) * n + z * h
        hs.append(h)
    dec = jnp.stack(hs, axis=1)                                          # [Bt, T, H] in vregs

    # ---- Global (dot) attention, batched over the Bt rows of this tile. ----
    mem = mem_ref[...]                                                   # [Bt, S, H] f32
    scores = jnp.einsum('bth,bsh->bts', dec, mem,
                        preferred_element_type=jnp.float32)              # [Bt, T, S]
    scores = jnp.where(mask_ref[...] > 0.5, scores, -1e9)                # length mask
    scores = scores - jnp.max(scores, axis=-1, keepdims=True)
    p = jnp.exp(scores)
    p = p * pl.reciprocal(jnp.sum(p, axis=-1, keepdims=True), approx=True)
    ctx = jnp.einsum('bts,bsh->bth', p, mem,
                     preferred_element_type=jnp.float32)                 # [Bt, T, H]

    # attn_h = tanh([ctx; q] @ W_out) with split weights (no lane-axis concat); 2-D dots.
    dec2 = dec.reshape(Bt * T, H)
    ctx2 = ctx.reshape(Bt * T, H)
    attn_h = jnp.tanh(jnp.dot(ctx2, wc_ref[...], preferred_element_type=jnp.float32)
                      + jnp.dot(dec2, wq_ref[...], preferred_element_type=jnp.float32))

    # Value head: multiply by the [1,H] weight row and lane-reduce; one [Bt, T] block store.
    vals = jnp.sum(attn_h.reshape(Bt, T, H) * wval_ref[...], axis=-1) + bval_ref[...]
    out_ref[...] = vals


def gru_value_decoder(targets, memory, states, memory_lengths, params, block_b=8):
    """JAX wrapper replicating GRUValueDecoder.forward (eval mode)."""
    B, T = targets.shape
    S = memory.shape[1]
    H = states.shape[-1]
    E = params["emb"].shape[1]
    Hp = ((H + 127) // 128) * 128                       # per-gate lane padding

    # Embedding gather (data-dependent) stays in XLA; dropout is identity in eval.
    embs = jnp.take(params["emb"], targets, axis=0)                     # [B, T, E]
    embs_tm = jnp.transpose(embs, (1, 0, 2)).astype(jnp.float32)        # [T, B, E] time-major
    h0 = states[0].astype(jnp.float32)                                  # [B, H]
    mem = memory.astype(jnp.float32)                                    # [B, S, H]
    mask = (jnp.arange(S)[None, :] < memory_lengths[:, None]).astype(jnp.float32)
    mask = jnp.broadcast_to(mask[:, None, :], (B, T, S))                # [B, T, S] metadata

    # Gate-stacked, lane-padded weights (r, z, n); r/z input+hidden biases pre-summed.
    def padg(w):
        return jnp.pad(w, [(0, 0)] * (w.ndim - 1) + [(0, Hp - H)])

    wih_st = jnp.concatenate([padg(params["wih"][g]) for g in range(3)],
                             axis=-1).astype(jnp.bfloat16)              # [E, 3Hp]
    whh_st = jnp.concatenate([padg(params["whh"][g]) for g in range(3)],
                             axis=-1).astype(jnp.float32)               # [H, 3Hp]
    gib = jnp.concatenate([padg((params["bih"][0] + params["bhh"][0])[None, :]),
                           padg((params["bih"][1] + params["bhh"][1])[None, :]),
                           padg(params["bih"][2][None, :])], axis=-1).astype(jnp.float32)
    ghb = jnp.concatenate([jnp.zeros((1, Hp), jnp.float32),
                           jnp.zeros((1, Hp), jnp.float32),
                           padg(params["bhh"][2][None, :])], axis=-1).astype(jnp.float32)

    # Batch tiling (Bt rows per grid step); pad batch to a multiple of Bt.
    Bt = block_b
    Bpad = ((B + Bt - 1) // Bt) * Bt
    padn = Bpad - B
    if padn:
        embs_tm = jnp.pad(embs_tm, ((0, 0), (0, padn), (0, 0)))
        h0 = jnp.pad(h0, ((0, padn), (0, 0)))
        mem = jnp.pad(mem, ((0, padn), (0, 0), (0, 0)))
        mask = jnp.pad(mask, ((0, padn), (0, 0), (0, 0)))

    grid_spec = pltpu.PrefetchScalarGridSpec(
        num_scalar_prefetch=0,
        grid=(Bpad // Bt,),
        in_specs=[
            pl.BlockSpec((T, Bt, E), lambda b: (0, b, 0)),      # embs (time-major)
            pl.BlockSpec((Bt, H), lambda b: (b, 0)),            # h0
            pl.BlockSpec((Bt, S, H), lambda b: (b, 0, 0)),      # memory
            pl.BlockSpec((Bt, T, S), lambda b: (b, 0, 0)),      # length mask
            pl.BlockSpec((E, 3 * Hp), lambda b: (0, 0)),        # W_ih stacked (resident)
            pl.BlockSpec((H, 3 * Hp), lambda b: (0, 0)),        # W_hh stacked (resident)
            pl.BlockSpec((1, 3 * Hp), lambda b: (0, 0)),        # input-proj biases
            pl.BlockSpec((1, 3 * Hp), lambda b: (0, 0)),        # hidden-proj bias (n slab)
            pl.BlockSpec((H, H), lambda b: (0, 0)),             # W_attn (ctx half)
            pl.BlockSpec((H, H), lambda b: (0, 0)),             # W_attn (query half)
            pl.BlockSpec((1, H), lambda b: (0, 0)),             # W_val row
            pl.BlockSpec((1, 1), lambda b: (0, 0)),             # b_val
        ],
        out_specs=pl.BlockSpec((Bt, T), lambda b: (b, 0)),
    )

    out = pl.pallas_call(
        gru_value_decoder_kernel,
        out_shape=jax.ShapeDtypeStruct((Bpad, T), jnp.float32),
        grid_spec=grid_spec,
        compiler_params=pltpu.CompilerParams(dimension_semantics=("parallel",)),
    )(embs_tm, h0, mem, mask, wih_st, whh_st, gib, ghb,
      params["wattn_c"].astype(jnp.float32), params["wattn_q"].astype(jnp.float32),
      params["wval"].astype(jnp.float32), params["bval"].astype(jnp.float32))
    return out[:B]                                                      # [B, T]


def reference_forward(targets, memory, states, memory_lengths, params):
    """Pure-JAX (f32) reference with identical math, for verification."""
    embs = jnp.take(params["emb"], targets, axis=0).astype(jnp.float32)   # [B, T, E]
    h0 = states[0].astype(jnp.float32)                                    # [B, H]
    wih, whh = params["wih"], params["whh"]
    bih, bhh = params["bih"], params["bhh"]

    def gru_step(h, x_t):                                                 # x_t: [B, E]
        gi = jnp.einsum('be,geh->gbh', x_t, wih) + bih[:, None, :]
        gh = jnp.einsum('bh,ghk->gbk', h, whh) + bhh[:, None, :]
        r = jax.nn.sigmoid(gi[0] + gh[0])
        z = jax.nn.sigmoid(gi[1] + gh[1])
        n = jnp.tanh(gi[2] + r * gh[2])
        h_new = (1.0 - z) * n + z * h
        return h_new, h_new

    _, dec = jax.lax.scan(gru_step, h0, jnp.transpose(embs, (1, 0, 2)))   # [T, B, H]
    dec = jnp.transpose(dec, (1, 0, 2))                                   # [B, T, H]

    memf = memory.astype(jnp.float32)
    scores = jnp.einsum('bth,bsh->bts', dec, memf)
    mask = jnp.arange(memory.shape[1])[None, None, :] < memory_lengths[:, None, None]
    scores = jnp.where(mask, scores, -1e9)
    p = jax.nn.softmax(scores, axis=-1)
    ctx = jnp.einsum('bts,bsh->bth', p, memf)
    attn_h = jnp.tanh(ctx @ params["wattn_c"] + dec @ params["wattn_q"])
    vals = jnp.einsum('bth,h->bt', attn_h, params["wval"][0]) + params["bval"][0, 0]
    return vals                                                           # [B, T]


def init_params(key, vocab, emb_dim, hidden):
    keys = jax.random.split(key, 9)
    k = 1.0 / np.sqrt(hidden)
    return {
        "emb":     jax.random.normal(keys[0], (vocab, emb_dim), jnp.float32) * 0.1,
        "wih":     jax.random.uniform(keys[1], (3, emb_dim, hidden), jnp.float32, -k, k),
        "whh":     jax.random.uniform(keys[2], (3, hidden, hidden), jnp.float32, -k, k),
        "bih":     jax.random.uniform(keys[3], (3, hidden), jnp.float32, -k, k),
        "bhh":     jax.random.uniform(keys[4], (3, hidden), jnp.float32, -k, k),
        "wattn_c": jax.random.uniform(keys[5], (hidden, hidden), jnp.float32, -k, k),
        "wattn_q": jax.random.uniform(keys[6], (hidden, hidden), jnp.float32, -k, k),
        "wval":    jax.random.uniform(keys[7], (1, hidden), jnp.float32, -k, k),
        "bval":    jax.random.uniform(keys[8], (1, 1), jnp.float32, -k, k),
    }


if __name__ == "__main__":
    # bsz, tgt seq, src seq, hidden, emb_dim, vocab  (B=16 with Bt=8 -> 2 parallel grid steps)
    B, T, S, H, E, V = 16, 8, 8, 32, 32, 50

    key = jax.random.PRNGKey(0)
    kp, kt, km, ks, kl = jax.random.split(key, 5)
    params = init_params(kp, V, E, H)

    targets = jax.random.randint(kt, (B, T), 0, V, dtype=jnp.int32)
    memory = jax.random.normal(km, (B, S, H), jnp.float32)
    states = jax.random.normal(ks, (1, B, H), jnp.float32)
    memory_lengths = jax.random.randint(kl, (B,), 1, S + 1, dtype=jnp.int32)

    values = gru_value_decoder(targets, memory, states, memory_lengths, params)
    values = jax.block_until_ready(values)
    assert values.shape == (B, T)

    ref = reference_forward(targets, memory, states, memory_lengths, params)
    np.testing.assert_allclose(np.asarray(values), np.asarray(ref), rtol=2e-2, atol=2e-2)

    print("KERNEL_OK")
</pallas_src>

<mosaic_0001>
module attributes {stable_mosaic.version = 11 : i64} {
  func.func @gru_value_decoder_kernel(%arg0: i32, %arg1: memref<8x8x32xf32, #tpu.memory_space<vmem>>, %arg2: memref<8x32xf32, #tpu.memory_space<vmem>>, %arg3: memref<8x8x32xf32, #tpu.memory_space<vmem>>, %arg4: memref<8x8x8xf32, #tpu.memory_space<vmem>>, %arg5: memref<32x384xbf16, #tpu.memory_space<vmem>>, %arg6: memref<32x384xf32, #tpu.memory_space<vmem>>, %arg7: memref<1x384xf32, #tpu.memory_space<vmem>>, %arg8: memref<1x384xf32, #tpu.memory_space<vmem>>, %arg9: memref<32x32xf32, #tpu.memory_space<vmem>>, %arg10: memref<32x32xf32, #tpu.memory_space<vmem>>, %arg11: memref<1x32xf32, #tpu.memory_space<vmem>>, %arg12: memref<1x1xf32, #tpu.memory_space<vmem>>, %arg13: memref<8x8xf32, #tpu.memory_space<vmem>>) attributes {dimension_semantics = [#tpu.dimension_semantics<parallel>], iteration_bounds = array<i64: 2>, scalar_prefetch = 0 : i64, scratch_operands = 0 : i64, tpu.core_type = #tpu.core_type<tc>, window_params = [{transform_indices = @transform_0, window_bounds = array<i64: 8, 8, 32>}, {transform_indices = @transform_1, window_bounds = array<i64: 8, 32>}, {transform_indices = @transform_2, window_bounds = array<i64: 8, 8, 32>}, {transform_indices = @transform_3, window_bounds = array<i64: 8, 8, 8>}, {pipeline_mode = #tpu.pipeline_mode<synchronous>, transform_indices = @transform_4, window_bounds = array<i64: 32, 384>}, {pipeline_mode = #tpu.pipeline_mode<synchronous>, transform_indices = @transform_5, window_bounds = array<i64: 32, 384>}, {pipeline_mode = #tpu.pipeline_mode<synchronous>, transform_indices = @transform_6, window_bounds = array<i64: 1, 384>}, {pipeline_mode = #tpu.pipeline_mode<synchronous>, transform_indices = @transform_7, window_bounds = array<i64: 1, 384>}, {pipeline_mode = #tpu.pipeline_mode<synchronous>, transform_indices = @transform_8, window_bounds = array<i64: 32, 32>}, {pipeline_mode = #tpu.pipeline_mode<synchronous>, transform_indices = @transform_9, window_bounds = array<i64: 32, 32>}, {pipeline_mode = #tpu.pipeline_mode<synchronous>, transform_indices = @transform_10, window_bounds = array<i64: 1, 32>}, {pipeline_mode = #tpu.pipeline_mode<synchronous>, transform_indices = @transform_11, window_bounds = array<i64: 1, 1>}, {transform_indices = @transform_12, window_bounds = array<i64: 8, 8>}]} {
    %c0 = arith.constant 0 : index
    %c0_0 = arith.constant 0 : index
    %c0_1 = arith.constant 0 : index
    %0 = vector.load %arg1[%c0, %c0_0, %c0_1] : memref<8x8x32xf32, #tpu.memory_space<vmem>>, vector<8x8x32xf32>
    %1 = vector.shape_cast %0 : vector<8x8x32xf32> to vector<64x32xf32>
    %2 = arith.truncf %1 : vector<64x32xf32> to vector<64x32xbf16>
    %c0_2 = arith.constant 0 : index
    %c0_3 = arith.constant 0 : index
    %3 = vector.load %arg5[%c0_2, %c0_3] : memref<32x384xbf16, #tpu.memory_space<vmem>>, vector<32x384xbf16>
    %cst = arith.constant dense<0.000000e+00> : vector<64x384xf32>
    %4 = tpu.matmul %2, %3, %cst {dimension_numbers = #tpu.dot_dimension_numbers<[1], [0], [0], [1], [0, 0, 1, 1], [], []>} : vector<64x32xbf16>, vector<32x384xbf16>, vector<64x384xf32> -> vector<64x384xf32>
    %c0_4 = arith.constant 0 : index
    %c0_5 = arith.constant 0 : index
    %5 = vector.load %arg7[%c0_4, %c0_5] : memref<1x384xf32, #tpu.memory_space<vmem>>, vector<1x384xf32>
    %6 = vector.broadcast %5 : vector<1x384xf32> to vector<64x384xf32>
    %7 = arith.addf %4, %6 : vector<64x384xf32>
    %8 = vector.shape_cast %7 : vector<64x384xf32> to vector<8x8x384xf32>
    %c0_6 = arith.constant 0 : index
    %c0_7 = arith.constant 0 : index
    %9 = vector.load %arg6[%c0_6, %c0_7] : memref<32x384xf32, #tpu.memory_space<vmem>>, vector<32x384xf32>
    %c0_8 = arith.constant 0 : index
    %c0_9 = arith.constant 0 : index
    %10 = vector.load %arg8[%c0_8, %c0_9] : memref<1x384xf32, #tpu.memory_space<vmem>>, vector<1x384xf32>
    %c0_10 = arith.constant 0 : index
    %c0_11 = arith.constant 0 : index
    %11 = vector.load %arg2[%c0_10, %c0_11] : memref<8x32xf32, #tpu.memory_space<vmem>>, vector<8x32xf32>
    %cst_12 = arith.constant dense<0.000000e+00> : vector<8x384xf32>
    %12 = tpu.matmul %11, %9, %cst_12 {dimension_numbers = #tpu.dot_dimension_numbers<[1], [0], [0], [1], [0, 0, 1, 1], [], []>} : vector<8x32xf32>, vector<32x384xf32>, vector<8x384xf32> -> vector<8x384xf32>
    %13 = vector.broadcast %10 : vector<1x384xf32> to vector<8x384xf32>
    %14 = arith.addf %12, %13 : vector<8x384xf32>
    %15 = vector.extract_strided_slice %8 {offsets = [0, 0, 0], sizes = [1, 8, 384], strides = [1, 1, 1]} : vector<8x8x384xf32> to vector<1x8x384xf32>
    %16 = vector.shape_cast %15 : vector<1x8x384xf32> to vector<8x384xf32>
    %17 = vector.extract_strided_slice %16 {offsets = [0, 0], sizes = [8, 32], strides = [1, 1]} : vector<8x384xf32> to vector<8x32xf32>
    %18 = vector.extract_strided_slice %14 {offsets = [0, 0], sizes = [8, 32], strides = [1, 1]} : vector<8x384xf32> to vector<8x32xf32>
    %19 = arith.addf %17, %18 : vector<8x32xf32>
    %20 = arith.negf %19 : vector<8x32xf32>
    %21 = math.exp %20 : vector<8x32xf32>
    %cst_13 = arith.constant 1.000000e+00 : f32
    %22 = vector.broadcast %cst_13 : f32 to vector<8x32xf32>
    %23 = arith.addf %22, %21 : vector<8x32xf32>
    %24 = arith.divf %22, %23 : vector<8x32xf32>
    %25 = vector.extract_strided_slice %16 {offsets = [0, 128], sizes = [8, 32], strides = [1, 1]} : vector<8x384xf32> to vector<8x32xf32>
    %26 = vector.extract_strided_slice %14 {offsets = [0, 128], sizes = [8, 32], strides = [1, 1]} : vector<8x384xf32> to vector<8x32xf32>
    %27 = arith.addf %25, %26 : vector<8x32xf32>
    %28 = arith.negf %27 : vector<8x32xf32>
    %29 = math.exp %28 : vector<8x32xf32>
    %cst_14 = arith.constant 1.000000e+00 : f32
    %30 = vector.broadcast %cst_14 : f32 to vector<8x32xf32>
    %31 = arith.addf %30, %29 : vector<8x32xf32>
    %32 = arith.divf %30, %31 : vector<8x32xf32>
    %33 = vector.extract_strided_slice %16 {offsets = [0, 256], sizes = [8, 32], strides = [1, 1]} : vector<8x384xf32> to vector<8x32xf32>
    %34 = vector.extract_strided_slice %14 {offsets = [0, 256], sizes = [8, 32], strides = [1, 1]} : vector<8x384xf32> to vector<8x32xf32>
    %35 = arith.mulf %24, %34 : vector<8x32xf32>
    %36 = arith.addf %33, %35 : vector<8x32xf32>
    %37 = math.tanh %36 : vector<8x32xf32>
    %cst_15 = arith.constant 1.000000e+00 : f32
    %38 = vector.broadcast %cst_15 : f32 to vector<8x32xf32>
    %39 = arith.subf %38, %32 : vector<8x32xf32>
    %40 = arith.mulf %39, %37 : vector<8x32xf32>
    %41 = arith.mulf %32, %11 : vector<8x32xf32>
    %42 = arith.addf %40, %41 : vector<8x32xf32>
    %cst_16 = arith.constant dense<0.000000e+00> : vector<8x384xf32>
    %43 = tpu.matmul %42, %9, %cst_16 {dimension_numbers = #tpu.dot_dimension_numbers<[1], [0], [0], [1], [0, 0, 1, 1], [], []>} : vector<8x32xf32>, vector<32x384xf32>, vector<8x384xf32> -> vector<8x384xf32>
    %44 = vector.broadcast %10 : vector<1x384xf32> to vector<8x384xf32>
    %45 = arith.addf %43, %44 : vector<8x384xf32>
    %46 = vector.extract_strided_slice %8 {offsets = [1, 0, 0], sizes = [1, 8, 384], strides = [1, 1, 1]} : vector<8x8x384xf32> to vector<1x8x384xf32>
    %47 = vector.shape_cast %46 : vector<1x8x384xf32> to vector<8x384xf32>
    %48 = vector.extract_strided_slice %47 {offsets = [0, 0], sizes = [8, 32], strides = [1, 1]} : vector<8x384xf32> to vector<8x32xf32>
    %49 = vector.extract_strided_slice %45 {offsets = [0, 0], sizes = [8, 32], strides = [1, 1]} : vector<8x384xf32> to vector<8x32xf32>
    %50 = arith.addf %48, %49 : vector<8x32xf32>
    %51 = arith.negf %50 : vector<8x32xf32>
    %52 = math.exp %51 : vector<8x32xf32>
    %cst_17 = arith.constant 1.000000e+00 : f32
    %53 = vector.broadcast %cst_17 : f32 to vector<8x32xf32>
    %54 = arith.addf %53, %52 : vector<8x32xf32>
    %55 = arith.divf %53, %54 : vector<8x32xf32>
    %56 = vector.extract_strided_slice %47 {offsets = [0, 128], sizes = [8, 32], strides = [1, 1]} : vector<8x384xf32> to vector<8x32xf32>
    %57 = vector.extract_strided_slice %45 {offsets = [0, 128], sizes = [8, 32], strides = [1, 1]} : vector<8x384xf32> to vector<8x32xf32>
    %58 = arith.addf %56, %57 : vector<8x32xf32>
    %59 = arith.negf %58 : vector<8x32xf32>
    %60 = math.exp %59 : vector<8x32xf32>
    %cst_18 = arith.constant 1.000000e+00 : f32
    %61 = vector.broadcast %cst_18 : f32 to vector<8x32xf32>
    %62 = arith.addf %61, %60 : vector<8x32xf32>
    %63 = arith.divf %61, %62 : vector<8x32xf32>
    %64 = vector.extract_strided_slice %47 {offsets = [0, 256], sizes = [8, 32], strides = [1, 1]} : vector<8x384xf32> to vector<8x32xf32>
    %65 = vector.extract_strided_slice %45 {offsets = [0, 256], sizes = [8, 32], strides = [1, 1]} : vector<8x384xf32> to vector<8x32xf32>
    %66 = arith.mulf %55, %65 : vector<8x32xf32>
    %67 = arith.addf %64, %66 : vector<8x32xf32>
    %68 = math.tanh %67 : vector<8x32xf32>
    %cst_19 = arith.constant 1.000000e+00 : f32
    %69 = vector.broadcast %cst_19 : f32 to vector<8x32xf32>
    %70 = arith.subf %69, %63 : vector<8x32xf32>
    %71 = arith.mulf %70, %68 : vector<8x32xf32>
    %72 = arith.mulf %63, %42 : vector<8x32xf32>
    %73 = arith.addf %71, %72 : vector<8x32xf32>
    %cst_20 = arith.constant dense<0.000000e+00> : vector<8x384xf32>
    %74 = tpu.matmul %73, %9, %cst_20 {dimension_numbers = #tpu.dot_dimension_numbers<[1], [0], [0], [1], [0, 0, 1, 1], [], []>} : vector<8x32xf32>, vector<32x384xf32>, vector<8x384xf32> -> vector<8x384xf32>
    %75 = vector.broadcast %10 : vector<1x384xf32> to vector<8x384xf32>
    %76 = arith.addf %74, %75 : vector<8x384xf32>
    %77 = vector.extract_strided_slice %8 {offsets = [2, 0, 0], sizes = [1, 8, 384], strides = [1, 1, 1]} : vector<8x8x384xf32> to vector<1x8x384xf32>
    %78 = vector.shape_cast %77 : vector<1x8x384xf32> to vector<8x384xf32>
    %79 = vector.extract_strided_slice %78 {offsets = [0, 0], sizes = [8, 32], strides = [1, 1]} : vector<8x384xf32> to vector<8x32xf32>
    %80 = vector.extract_strided_slice %76 {offsets = [0, 0], sizes = [8, 32], strides = [1, 1]} : vector<8x384xf32> to vector<8x32xf32>
    %81 = arith.addf %79, %80 : vector<8x32xf32>
    %82 = arith.negf %81 : vector<8x32xf32>
    %83 = math.exp %82 : vector<8x32xf32>
    %cst_21 = arith.constant 1.000000e+00 : f32
    %84 = vector.broadcast %cst_21 : f32 to vector<8x32xf32>
    %85 = arith.addf %84, %83 : vector<8x32xf32>
    %86 = arith.divf %84, %85 : vector<8x32xf32>
    %87 = vector.extract_strided_slice %78 {offsets = [0, 128], sizes = [8, 32], strides = [1, 1]} : vector<8x384xf32> to vector<8x32xf32>
    %88 = vector.extract_strided_slice %76 {offsets = [0, 128], sizes = [8, 32], strides = [1, 1]} : vector<8x384xf32> to vector<8x32xf32>
    %89 = arith.addf %87, %88 : vector<8x32xf32>
    %90 = arith.negf %89 : vector<8x32xf32>
    %91 = math.exp %90 : vector<8x32xf32>
    %cst_22 = arith.constant 1.000000e+00 : f32
    %92 = vector.broadcast %cst_22 : f32 to vector<8x32xf32>
    %93 = arith.addf %92, %91 : vector<8x32xf32>
    %94 = arith.divf %92, %93 : vector<8x32xf32>
    %95 = vector.extract_strided_slice %78 {offsets = [0, 256], sizes = [8, 32], strides = [1, 1]} : vector<8x384xf32> to vector<8x32xf32>
    %96 = vector.extract_strided_slice %76 {offsets = [0, 256], sizes = [8, 32], strides = [1, 1]} : vector<8x384xf32> to vector<8x32xf32>
    %97 = arith.mulf %86, %96 : vector<8x32xf32>
    %98 = arith.addf %95, %97 : vector<8x32xf32>
    %99 = math.tanh %98 : vector<8x32xf32>
    %cst_23 = arith.constant 1.000000e+00 : f32
    %100 = vector.broadcast %cst_23 : f32 to vector<8x32xf32>
    %101 = arith.subf %100, %94 : vector<8x32xf32>
    %102 = arith.mulf %101, %99 : vector<8x32xf32>
    %103 = arith.mulf %94, %73 : vector<8x32xf32>
    %104 = arith.addf %102, %103 : vector<8x32xf32>
    %cst_24 = arith.constant dense<0.000000e+00> : vector<8x384xf32>
    %105 = tpu.matmul %104, %9, %cst_24 {dimension_numbers = #tpu.dot_dimension_numbers<[1], [0], [0], [1], [0, 0, 1, 1], [], []>} : vector<8x32xf32>, vector<32x384xf32>, vector<8x384xf32> -> vector<8x384xf32>
    %106 = vector.broadcast %10 : vector<1x384xf32> to vector<8x384xf32>
    %107 = arith.addf %105, %106 : vector<8x384xf32>
    %108 = vector.extract_strided_slice %8 {offsets = [3, 0, 0], sizes = [1, 8, 384], strides = [1, 1, 1]} : vector<8x8x384xf32> to vector<1x8x384xf32>
    %109 = vector.shape_cast %108 : vector<1x8x384xf32> to vector<8x384xf32>
    %110 = vector.extract_strided_slice %109 {offsets = [0, 0], sizes = [8, 32], strides = [1, 1]} : vector<8x384xf32> to vector<8x32xf32>
    %111 = vector.extract_strided_slice %107 {offsets = [0, 0], sizes = [8, 32], strides = [1, 1]} : vector<8x384xf32> to vector<8x32xf32>
    %112 = arith.addf %110, %111 : vector<8x32xf32>
    %113 = arith.negf %112 : vector<8x32xf32>
    %114 = math.exp %113 : vector<8x32xf32>
    %cst_25 = arith.constant 1.000000e+00 : f32
    %115 = vector.broadcast %cst_25 : f32 to vector<8x32xf32>
    %116 = arith.addf %115, %114 : vector<8x32xf32>
    %117 = arith.divf %115, %116 : vector<8x32xf32>
    %118 = vector.extract_strided_slice %109 {offsets = [0, 128], sizes = [8, 32], strides = [1, 1]} : vector<8x384xf32> to vector<8x32xf32>
    %119 = vector.extract_strided_slice %107 {offsets = [0, 128], sizes = [8, 32], strides = [1, 1]} : vector<8x384xf32> to vector<8x32xf32>
    %120 = arith.addf %118, %119 : vector<8x32xf32>
    %121 = arith.negf %120 : vector<8x32xf32>
    %122 = math.exp %121 : vector<8x32xf32>
    %cst_26 = arith.constant 1.000000e+00 : f32
    %123 = vector.broadcast %cst_26 : f32 to vector<8x32xf32>
    %124 = arith.addf %123, %122 : vector<8x32xf32>
    %125 = arith.divf %123, %124 : vector<8x32xf32>
    %126 = vector.extract_strided_slice %109 {offsets = [0, 256], sizes = [8, 32], strides = [1, 1]} : vector<8x384xf32> to vector<8x32xf32>
    %127 = vector.extract_strided_slice %107 {offsets = [0, 256], sizes = [8, 32], strides = [1, 1]} : vector<8x384xf32> to vector<8x32xf32>
    %128 = arith.mulf %117, %127 : vector<8x32xf32>
    %129 = arith.addf %126, %128 : vector<8x32xf32>
    %130 = math.tanh %129 : vector<8x32xf32>
    %cst_27 = arith.constant 1.000000e+00 : f32
    %131 = vector.broadcast %cst_27 : f32 to vector<8x32xf32>
    %132 = arith.subf %131, %125 : vector<8x32xf32>
    %133 = arith.mulf %132, %130 : vector<8x32xf32>
    %134 = arith.mulf %125, %104 : vector<8x32xf32>
    %135 = arith.addf %133, %134 : vector<8x32xf32>
    %cst_28 = arith.constant dense<0.000000e+00> : vector<8x384xf32>
    %136 = tpu.matmul %135, %9, %cst_28 {dimension_numbers = #tpu.dot_dimension_numbers<[1], [0], [0], [1], [0, 0, 1, 1], [], []>} : vector<8x32xf32>, vector<32x384xf32>, vector<8x384xf32> -> vector<8x384xf32>
    %137 = vector.broadcast %10 : vector<1x384xf32> to vector<8x384xf32>
    %138 = arith.addf %136, %137 : vector<8x384xf32>
    %139 = vector.extract_strided_slice %8 {offsets = [4, 0, 0], sizes = [1, 8, 384], strides = [1, 1, 1]} : vector<8x8x384xf32> to vector<1x8x384xf32>
    %140 = vector.shape_cast %139 : vector<1x8x384xf32> to vector<8x384xf32>
    %141 = vector.extract_strided_slice %140 {offsets = [0, 0], sizes = [8, 32], strides = [1, 1]} : vector<8x384xf32> to vector<8x32xf32>
    %142 = vector.extract_strided_slice %138 {offsets = [0, 0], sizes = [8, 32], strides = [1, 1]} : vector<8x384xf32> to vector<8x32xf32>
    %143 = arith.addf %141, %142 : vector<8x32xf32>
    %144 = arith.negf %143 : vector<8x32xf32>
    %145 = math.exp %144 : vector<8x32xf32>
    %cst_29 = arith.constant 1.000000e+00 : f32
    %146 = vector.broadcast %cst_29 : f32 to vector<8x32xf32>
    %147 = arith.addf %146, %145 : vector<8x32xf32>
    %148 = arith.divf %146, %147 : vector<8x32xf32>
    %149 = vector.extract_strided_slice %140 {offsets = [0, 128], sizes = [8, 32], strides = [1, 1]} : vector<8x384xf32> to vector<8x32xf32>
    %150 = vector.extract_strided_slice %138 {offsets = [0, 128], sizes = [8, 32], strides = [1, 1]} : vector<8x384xf32> to vector<8x32xf32>
    %151 = arith.addf %149, %150 : vector<8x32xf32>
    %152 = arith.negf %151 : vector<8x32xf32>
    %153 = math.exp %152 : vector<8x32xf32>
    %cst_30 = arith.constant 1.000000e+00 : f32
    %154 = vector.broadcast %cst_30 : f32 to vector<8x32xf32>
    %155 = arith.addf %154, %153 : vector<8x32xf32>
    %156 = arith.divf %154, %155 : vector<8x32xf32>
    %157 = vector.extract_strided_slice %140 {offsets = [0, 256], sizes = [8, 32], strides = [1, 1]} : vector<8x384xf32> to vector<8x32xf32>
    %158 = vector.extract_strided_slice %138 {offsets = [0, 256], sizes = [8, 32], strides = [1, 1]} : vector<8x384xf32> to vector<8x32xf32>
    %159 = arith.mulf %148, %158 : vector<8x32xf32>
    %160 = arith.addf %157, %159 : vector<8x32xf32>
    %161 = math.tanh %160 : vector<8x32xf32>
    %cst_31 = arith.constant 1.000000e+00 : f32
    %162 = vector.broadcast %cst_31 : f32 to vector<8x32xf32>
    %163 = arith.subf %162, %156 : vector<8x32xf32>
    %164 = arith.mulf %163, %161 : vector<8x32xf32>
    %165 = arith.mulf %156, %135 : vector<8x32xf32>
    %166 = arith.addf %164, %165 : vector<8x32xf32>
    %cst_32 = arith.constant dense<0.000000e+00> : vector<8x384xf32>
    %167 = tpu.matmul %166, %9, %cst_32 {dimension_numbers = #tpu.dot_dimension_numbers<[1], [0], [0], [1], [0, 0, 1, 1], [], []>} : vector<8x32xf32>, vector<32x384xf32>, vector<8x384xf32> -> vector<8x384xf32>
    %168 = vector.broadcast %10 : vector<1x384xf32> to vector<8x384xf32>
    %169 = arith.addf %167, %168 : vector<8x384xf32>
    %170 = vector.extract_strided_slice %8 {offsets = [5, 0, 0], sizes = [1, 8, 384], strides = [1, 1, 1]} : vector<8x8x384xf32> to vector<1x8x384xf32>
    %171 = vector.shape_cast %170 : vector<1x8x384xf32> to vector<8x384xf32>
    %172 = vector.extract_strided_slice %171 {offsets = [0, 0], sizes = [8, 32], strides = [1, 1]} : vector<8x384xf32> to vector<8x32xf32>
    %173 = vector.extract_strided_slice %169 {offsets = [0, 0], sizes = [8, 32], strides = [1, 1]} : vector<8x384xf32> to vector<8x32xf32>
    %174 = arith.addf %172, %173 : vector<8x32xf32>
    %175 = arith.negf %174 : vector<8x32xf32>
    %176 = math.exp %175 : vector<8x32xf32>
    %cst_33 = arith.constant 1.000000e+00 : f32
    %177 = vector.broadcast %cst_33 : f32 to vector<8x32xf32>
    %178 = arith.addf %177, %176 : vector<8x32xf32>
    %179 = arith.divf %177, %178 : vector<8x32xf32>
    %180 = vector.extract_strided_slice %171 {offsets = [0, 128], sizes = [8, 32], strides = [1, 1]} : vector<8x384xf32> to vector<8x32xf32>
    %181 = vector.extract_strided_slice %169 {offsets = [0, 128], sizes = [8, 32], strides = [1, 1]} : vector<8x384xf32> to vector<8x32xf32>
    %182 = arith.addf %180, %181 : vector<8x32xf32>
    %183 = arith.negf %182 : vector<8x32xf32>
    %184 = math.exp %183 : vector<8x32xf32>
    %cst_34 = arith.constant 1.000000e+00 : f32
    %185 = vector.broadcast %cst_34 : f32 to vector<8x32xf32>
    %186 = arith.addf %185, %184 : vector<8x32xf32>
    %187 = arith.divf %185, %186 : vector<8x32xf32>
    %188 = vector.extract_strided_slice %171 {offsets = [0, 256], sizes = [8, 32], strides = [1, 1]} : vector<8x384xf32> to vector<8x32xf32>
    %189 = vector.extract_strided_slice %169 {offsets = [0, 256], sizes = [8, 32], strides = [1, 1]} : vector<8x384xf32> to vector<8x32xf32>
    %190 = arith.mulf %179, %189 : vector<8x32xf32>
    %191 = arith.addf %188, %190 : vector<8x32xf32>
    %192 = math.tanh %191 : vector<8x32xf32>
    %cst_35 = arith.constant 1.000000e+00 : f32
    %193 = vector.broadcast %cst_35 : f32 to vector<8x32xf32>
    %194 = arith.subf %193, %187 : vector<8x32xf32>
    %195 = arith.mulf %194, %192 : vector<8x32xf32>
    %196 = arith.mulf %187, %166 : vector<8x32xf32>
    %197 = arith.addf %195, %196 : vector<8x32xf32>
    %cst_36 = arith.constant dense<0.000000e+00> : vector<8x384xf32>
    %198 = tpu.matmul %197, %9, %cst_36 {dimension_numbers = #tpu.dot_dimension_numbers<[1], [0], [0], [1], [0, 0, 1, 1], [], []>} : vector<8x32xf32>, vector<32x384xf32>, vector<8x384xf32> -> vector<8x384xf32>
    %199 = vector.broadcast %10 : vector<1x384xf32> to vector<8x384xf32>
    %200 = arith.addf %198, %199 : vector<8x384xf32>
    %201 = vector.extract_strided_slice %8 {offsets = [6, 0, 0], sizes = [1, 8, 384], strides = [1, 1, 1]} : vector<8x8x384xf32> to vector<1x8x384xf32>
    %202 = vector.shape_cast %201 : vector<1x8x384xf32> to vector<8x384xf32>
    %203 = vector.extract_strided_slice %202 {offsets = [0, 0], sizes = [8, 32], strides = [1, 1]} : vector<8x384xf32> to vector<8x32xf32>
    %204 = vector.extract_strided_slice %200 {offsets = [0, 0], sizes = [8, 32], strides = [1, 1]} : vector<8x384xf32> to vector<8x32xf32>
    %205 = arith.addf %203, %204 : vector<8x32xf32>
    %206 = arith.negf %205 : vector<8x32xf32>
    %207 = math.exp %206 : vector<8x32xf32>
    %cst_37 = arith.constant 1.000000e+00 : f32
    %208 = vector.broadcast %cst_37 : f32 to vector<8x32xf32>
    %209 = arith.addf %208, %207 : vector<8x32xf32>
    %210 = arith.divf %208, %209 : vector<8x32xf32>
    %211 = vector.extract_strided_slice %202 {offsets = [0, 128], sizes = [8, 32], strides = [1, 1]} : vector<8x384xf32> to vector<8x32xf32>
    %212 = vector.extract_strided_slice %200 {offsets = [0, 128], sizes = [8, 32], strides = [1, 1]} : vector<8x384xf32> to vector<8x32xf32>
    %213 = arith.addf %211, %212 : vector<8x32xf32>
    %214 = arith.negf %213 : vector<8x32xf32>
    %215 = math.exp %214 : vector<8x32xf32>
    %cst_38 = arith.constant 1.000000e+00 : f32
    %216 = vector.broadcast %cst_38 : f32 to vector<8x32xf32>
    %217 = arith.addf %216, %215 : vector<8x32xf32>
    %218 = arith.divf %216, %217 : vector<8x32xf32>
    %219 = vector.extract_strided_slice %202 {offsets = [0, 256], sizes = [8, 32], strides = [1, 1]} : vector<8x384xf32> to vector<8x32xf32>
    %220 = vector.extract_strided_slice %200 {offsets = [0, 256], sizes = [8, 32], strides = [1, 1]} : vector<8x384xf32> to vector<8x32xf32>
    %221 = arith.mulf %210, %220 : vector<8x32xf32>
    %222 = arith.addf %219, %221 : vector<8x32xf32>
    %223 = math.tanh %222 : vector<8x32xf32>
    %cst_39 = arith.constant 1.000000e+00 : f32
    %224 = vector.broadcast %cst_39 : f32 to vector<8x32xf32>
    %225 = arith.subf %224, %218 : vector<8x32xf32>
    %226 = arith.mulf %225, %223 : vector<8x32xf32>
    %227 = arith.mulf %218, %197 : vector<8x32xf32>
    %228 = arith.addf %226, %227 : vector<8x32xf32>
    %cst_40 = arith.constant dense<0.000000e+00> : vector<8x384xf32>
    %229 = tpu.matmul %228, %9, %cst_40 {dimension_numbers = #tpu.dot_dimension_numbers<[1], [0], [0], [1], [0, 0, 1, 1], [], []>} : vector<8x32xf32>, vector<32x384xf32>, vector<8x384xf32> -> vector<8x384xf32>
    %230 = vector.broadcast %10 : vector<1x384xf32> to vector<8x384xf32>
    %231 = arith.addf %229, %230 : vector<8x384xf32>
    %232 = vector.extract_strided_slice %8 {offsets = [7, 0, 0], sizes = [1, 8, 384], strides = [1, 1, 1]} : vector<8x8x384xf32> to vector<1x8x384xf32>
    %233 = vector.shape_cast %232 : vector<1x8x384xf32> to vector<8x384xf32>
    %234 = vector.extract_strided_slice %233 {offsets = [0, 0], sizes = [8, 32], strides = [1, 1]} : vector<8x384xf32> to vector<8x32xf32>
    %235 = vector.extract_strided_slice %231 {offsets = [0, 0], sizes = [8, 32], strides = [1, 1]} : vector<8x384xf32> to vector<8x32xf32>
    %236 = arith.addf %234, %235 : vector<8x32xf32>
    %237 = arith.negf %236 : vector<8x32xf32>
    %238 = math.exp %237 : vector<8x32xf32>
    %cst_41 = arith.constant 1.000000e+00 : f32
    %239 = vector.broadcast %cst_41 : f32 to vector<8x32xf32>
    %240 = arith.addf %239, %238 : vector<8x32xf32>
    %241 = arith.divf %239, %240 : vector<8x32xf32>
    %242 = vector.extract_strided_slice %233 {offsets = [0, 128], sizes = [8, 32], strides = [1, 1]} : vector<8x384xf32> to vector<8x32xf32>
    %243 = vector.extract_strided_slice %231 {offsets = [0, 128], sizes = [8, 32], strides = [1, 1]} : vector<8x384xf32> to vector<8x32xf32>
    %244 = arith.addf %242, %243 : vector<8x32xf32>
    %245 = arith.negf %244 : vector<8x32xf32>
    %246 = math.exp %245 : vector<8x32xf32>
    %cst_42 = arith.constant 1.000000e+00 : f32
    %247 = vector.broadcast %cst_42 : f32 to vector<8x32xf32>
    %248 = arith.addf %247, %246 : vector<8x32xf32>
    %249 = arith.divf %247, %248 : vector<8x32xf32>
    %250 = vector.extract_strided_slice %233 {offsets = [0, 256], sizes = [8, 32], strides = [1, 1]} : vector<8x384xf32> to vector<8x32xf32>
    %251 = vector.extract_strided_slice %231 {offsets = [0, 256], sizes = [8, 32], strides = [1, 1]} : vector<8x384xf32> to vector<8x32xf32>
    %252 = arith.mulf %241, %251 : vector<8x32xf32>
    %253 = arith.addf %250, %252 : vector<8x32xf32>
    %254 = math.tanh %253 : vector<8x32xf32>
    %cst_43 = arith.constant 1.000000e+00 : f32
    %255 = vector.broadcast %cst_43 : f32 to vector<8x32xf32>
    %256 = arith.subf %255, %249 : vector<8x32xf32>
    %257 = arith.mulf %256, %254 : vector<8x32xf32>
    %258 = arith.mulf %249, %228 : vector<8x32xf32>
    %259 = arith.addf %257, %258 : vector<8x32xf32>
    %260 = vector.shape_cast %42 : vector<8x32xf32> to vector<8x1x32xf32>
    %261 = vector.shape_cast %73 : vector<8x32xf32> to vector<8x1x32xf32>
    %262 = vector.shape_cast %104 : vector<8x32xf32> to vector<8x1x32xf32>
    %263 = vector.shape_cast %135 : vector<8x32xf32> to vector<8x1x32xf32>
    %264 = vector.shape_cast %166 : vector<8x32xf32> to vector<8x1x32xf32>
    %265 = vector.shape_cast %197 : vector<8x32xf32> to vector<8x1x32xf32>
    %266 = vector.shape_cast %228 : vector<8x32xf32> to vector<8x1x32xf32>
    %267 = vector.shape_cast %259 : vector<8x32xf32> to vector<8x1x32xf32>
    %268 = tpu.concatenate %260, %261, %262, %263, %264, %265, %266, %267 in 1 : vector<8x1x32xf32>, vector<8x1x32xf32>, vector<8x1x32xf32>, vector<8x1x32xf32>, vector<8x1x32xf32>, vector<8x1x32xf32>, vector<8x1x32xf32>, vector<8x1x32xf32> -> vector<8x8x32xf32>
    %c0_44 = arith.constant 0 : index
    %c0_45 = arith.constant 0 : index
    %c0_46 = arith.constant 0 : index
    %269 = vector.load %arg3[%c0_44, %c0_45, %c0_46] : memref<8x8x32xf32, #tpu.memory_space<vmem>>, vector<8x8x32xf32>
    "tpu.trace_start"() <{level = 10 : i32, message = "bth,bsh->bts"}> : () -> ()
    %cst_47 = arith.constant dense<0.000000e+00> : vector<8x8x8xf32>
    %270 = tpu.matmul %268, %269, %cst_47 {dimension_numbers = #tpu.dot_dimension_numbers<[2], [2], [1], [1], [0, 0, 0, 1, 1, 1], [0], [0]>} : vector<8x8x32xf32>, vector<8x8x32xf32>, vector<8x8x8xf32> -> vector<8x8x8xf32>
    "tpu.trace_stop"() : () -> ()
    %c0_48 = arith.constant 0 : index
    %c0_49 = arith.constant 0 : index
    %c0_50 = arith.constant 0 : index
    %271 = vector.load %arg4[%c0_48, %c0_49, %c0_50] : memref<8x8x8xf32, #tpu.memory_space<vmem>>, vector<8x8x8xf32>
    %cst_51 = arith.constant 5.000000e-01 : f32
    %272 = vector.broadcast %cst_51 : f32 to vector<8x8x8xf32>
    %273 = arith.cmpf ogt, %271, %272 : vector<8x8x8xf32>
    %cst_52 = arith.constant -1.000000e+09 : f32
    %274 = vector.broadcast %cst_52 : f32 to vector<8x8x8xf32>
    %275 = arith.select %273, %270, %274 : vector<8x8x8xi1>, vector<8x8x8xf32>
    %cst_53 = arith.constant dense<0xFF800000> : vector<8x8xf32>
    %276 = vector.multi_reduction <maximumf>, %275, %cst_53 [2] : vector<8x8x8xf32> to vector<8x8xf32>
    %277 = vector.shape_cast %276 : vector<8x8xf32> to vector<8x8x1xf32>
    %278 = vector.broadcast %277 : vector<8x8x1xf32> to vector<8x8x8xf32>
    %279 = arith.subf %275, %278 : vector<8x8x8xf32>
    %280 = math.exp %279 : vector<8x8x8xf32>
    %cst_54 = arith.constant dense<0.000000e+00> : vector<8x8xf32>
    %281 = vector.multi_reduction <add>, %280, %cst_54 [2] : vector<8x8x8xf32> to vector<8x8xf32>
    %282 = vector.shape_cast %281 : vector<8x8xf32> to vector<8x8x1xf32>
    %283 = tpu.reciprocal %282 {approx = true} : vector<8x8x1xf32> -> vector<8x8x1xf32>
    %284 = vector.broadcast %283 : vector<8x8x1xf32> to vector<8x8x8xf32>
    %285 = arith.mulf %280, %284 : vector<8x8x8xf32>
    "tpu.trace_start"() <{level = 10 : i32, message = "bts,bsh->bth"}> : () -> ()
    %cst_55 = arith.constant dense<0.000000e+00> : vector<8x8x32xf32>
    %286 = tpu.matmul %285, %269, %cst_55 {dimension_numbers = #tpu.dot_dimension_numbers<[2], [1], [1], [2], [0, 0, 0, 1, 1, 2], [0], [0]>} : vector<8x8x8xf32>, vector<8x8x32xf32>, vector<8x8x32xf32> -> vector<8x8x32xf32>
    "tpu.trace_stop"() : () -> ()
    %287 = vector.shape_cast %268 : vector<8x8x32xf32> to vector<64x32xf32>
    %288 = vector.shape_cast %286 : vector<8x8x32xf32> to vector<64x32xf32>
    %c0_56 = arith.constant 0 : index
    %c0_57 = arith.constant 0 : index
    %289 = vector.load %arg9[%c0_56, %c0_57] : memref<32x32xf32, #tpu.memory_space<vmem>>, vector<32x32xf32>
    %cst_58 = arith.constant dense<0.000000e+00> : vector<64x32xf32>
    %290 = tpu.matmul %288, %289, %cst_58 {dimension_numbers = #tpu.dot_dimension_numbers<[1], [0], [0], [1], [0, 0, 1, 1], [], []>} : vector<64x32xf32>, vector<32x32xf32>, vector<64x32xf32> -> vector<64x32xf32>
    %c0_59 = arith.constant 0 : index
    %c0_60 = arith.constant 0 : index
    %291 = vector.load %arg10[%c0_59, %c0_60] : memref<32x32xf32, #tpu.memory_space<vmem>>, vector<32x32xf32>
    %cst_61 = arith.constant dense<0.000000e+00> : vector<64x32xf32>
    %292 = tpu.matmul %287, %291, %cst_61 {dimension_numbers = #tpu.dot_dimension_numbers<[1], [0], [0], [1], [0, 0, 1, 1], [], []>} : vector<64x32xf32>, vector<32x32xf32>, vector<64x32xf32> -> vector<64x32xf32>
    %293 = arith.addf %290, %292 : vector<64x32xf32>
    %294 = math.tanh %293 : vector<64x32xf32>
    %295 = vector.shape_cast %294 : vector<64x32xf32> to vector<8x8x32xf32>
    %c0_62 = arith.constant 0 : index
    %c0_63 = arith.constant 0 : index
    %296 = vector.load %arg11[%c0_62, %c0_63] : memref<1x32xf32, #tpu.memory_space<vmem>>, vector<1x32xf32>
    %297 = vector.shape_cast %296 : vector<1x32xf32> to vector<1x1x32xf32>
    %298 = vector.broadcast %297 : vector<1x1x32xf32> to vector<8x8x32xf32>
    %299 = arith.mulf %295, %298 : vector<8x8x32xf32>
    %cst_64 = arith.constant dense<0.000000e+00> : vector<8x8xf32>
    %300 = vector.multi_reduction <add>, %299, %cst_64 [2] : vector<8x8x32xf32> to vector<8x8xf32>
    %c0_65 = arith.constant 0 : index
    %c0_66 = arith.constant 0 : index
    %301 = vector.load %arg12[%c0_65, %c0_66] : memref<1x1xf32, #tpu.memory_space<vmem>>, vector<1x1xf32>
    %302 = vector.broadcast %301 : vector<1x1xf32> to vector<8x8xf32>
    %303 = arith.addf %300, %302 : vector<8x8xf32>
    %c0_67 = arith.constant 0 : index
    %c0_68 = arith.constant 0 : index
    %304 = vector.load %arg13[%c0_67, %c0_68] : memref<8x8xf32, #tpu.memory_space<vmem>>, vector<8x8xf32>
    tpu.vector_store %arg13[%c0_67, %c0_68], %303 {strides = array<i32>} : memref<8x8xf32, #tpu.memory_space<vmem>>, vector<8x8xf32>,
    return
  }
  func.func @transform_0(%arg0: i32) -> (i32, i32, i32) {
    %c0_i32 = arith.constant 0 : i32
    %c0_i32_0 = arith.constant 0 : i32
    %c0_i32_1 = arith.constant 0 : i32
    return %c0_i32, %arg0, %c0_i32_0 : i32, i32, i32
  }
  func.func @transform_1(%arg0: i32) -> (i32, i32) {
    %c0_i32 = arith.constant 0 : i32
    %c0_i32_0 = arith.constant 0 : i32
    return %arg0, %c0_i32 : i32, i32
  }
  func.func @transform_2(%arg0: i32) -> (i32, i32, i32) {
    %c0_i32 = arith.constant 0 : i32
    %c0_i32_0 = arith.constant 0 : i32
    %c0_i32_1 = arith.constant 0 : i32
    return %arg0, %c0_i32, %c0_i32_0 : i32, i32, i32
  }
  func.func @transform_3(%arg0: i32) -> (i32, i32, i32) {
    %c0_i32 = arith.constant 0 : i32
    %c0_i32_0 = arith.constant 0 : i32
    %c0_i32_1 = arith.constant 0 : i32
    return %arg0, %c0_i32, %c0_i32_0 : i32, i32, i32
  }
  func.func @transform_4(%arg0: i32) -> (i32, i32) {
    %c0_i32 = arith.constant 0 : i32
    %c0_i32_0 = arith.constant 0 : i32
    %c0_i32_1 = arith.constant 0 : i32
    return %c0_i32, %c0_i32_0 : i32, i32
  }
  func.func @transform_5(%arg0: i32) -> (i32, i32) {
    %c0_i32 = arith.constant 0 : i32
    %c0_i32_0 = arith.constant 0 : i32
    %c0_i32_1 = arith.constant 0 : i32
    return %c0_i32, %c0_i32_0 : i32, i32
  }
  func.func @transform_6(%arg0: i32) -> (i32, i32) {
    %c0_i32 = arith.constant 0 : i32
    %c0_i32_0 = arith.constant 0 : i32
    %c0_i32_1 = arith.constant 0 : i32
    return %c0_i32, %c0_i32_0 : i32, i32
  }
  func.func @transform_7(%arg0: i32) -> (i32, i32) {
    %c0_i32 = arith.constant 0 : i32
    %c0_i32_0 = arith.constant 0 : i32
    %c0_i32_1 = arith.constant 0 : i32
    return %c0_i32, %c0_i32_0 : i32, i32
  }
  func.func @transform_8(%arg0: i32) -> (i32, i32) {
    %c0_i32 = arith.constant 0 : i32
    %c0_i32_0 = arith.constant 0 : i32
    %c0_i32_1 = arith.constant 0 : i32
    return %c0_i32, %c0_i32_0 : i32, i32
  }
  func.func @transform_9(%arg0: i32) -> (i32, i32) {
    %c0_i32 = arith.constant 0 : i32
    %c0_i32_0 = arith.constant 0 : i32
    %c0_i32_1 = arith.constant 0 : i32
    return %c0_i32, %c0_i32_0 : i32, i32
  }
  func.func @transform_10(%arg0: i32) -> (i32, i32) {
    %c0_i32 = arith.constant 0 : i32
    %c0_i32_0 = arith.constant 0 : i32
    %c0_i32_1 = arith.constant 0 : i32
    return %c0_i32, %c0_i32_0 : i32, i32
  }
  func.func @transform_11(%arg0: i32) -> (i32, i32) {
    %c0_i32 = arith.constant 0 : i32
    %c0_i32_0 = arith.constant 0 : i32
    %c0_i32_1 = arith.constant 0 : i32
    return %c0_i32, %c0_i32_0 : i32, i32
  }
  func.func @transform_12(%arg0: i32) -> (i32, i32) {
    %c0_i32 = arith.constant 0 : i32
    %c0_i32_0 = arith.constant 0 : i32
    return %arg0, %c0_i32 : i32, i32
  }
}

</mosaic_0001>

<bundles_post_ra>
// kernel: tpu_custom_call.1
= control target key start
LH: loop header
LB: loop body
LE: loop exit
PB: predicated region body
PF: predicated region fallthrough
CT: control target
= control target key end

     0   :  { %s4171_s0 = inlined_call_operand.vmem [shape: f32[8,16,32], index: 0, kind: input, shape index: {}]   ;;  %s4172_s1 = inlined_call_operand.vmem [shape: f32[16,32], index: 1, kind: input, shape index: {}]   ;;  %s4173_s2 = inlined_call_operand.hbm [shape: f32[16,8,32], index: 2, kind: input, shape index: {}]   ;;  %s4174_s3 = inlined_call_operand.vmem [shape: f32[16,8,8], index: 3, kind: input, shape index: {}]   ;;  %s4175_s4 = inlined_call_operand.vmem [shape: bf16[32,384], index: 4, kind: input, shape index: {}]   ;;  %s4176_s5 = inlined_call_operand.hbm [shape: f32[32,384], index: 5, kind: input, shape index: {}]   ;;  %s4177_s6 = inlined_call_operand.vmem [shape: f32[1,384], index: 6, kind: input, shape index: {}]   ;;  %s4178_s7 = inlined_call_operand.vmem [shape: f32[1,384], index: 7, kind: input, shape index: {}]   ;;  %s4179_s8 = inlined_call_operand.hbm [shape: f32[32,32], index: 8, kind: input, shape index: {}]   ;;  %s4180_s9 = inlined_call_operand.hbm [shape: f32[32,32], index: 9, kind: input, shape index: {}]   ;;  %s4181_s10 = inlined_call_operand.vmem [shape: f32[1,32], index: 10, kind: input, shape index: {}]   ;;  %s4182_s11 = inlined_call_operand.<no memory space> [shape: f32[1,1], index: 11, kind: input, shape index: {}]   ;;  %s4183_s12 = inlined_call_operand.vmem [shape: f32[16,8], index: 12, kind: output, shape index: {}]  }
   0x1   :  { %4186 = sst [smem:[#allocation16_spill]] %s4176_s5  ;;  %v17_v0 = vstv %s4182_s11 }
   0x2   :  { %4187 = sst [smem:[#allocation17_spill]] %s4179_s8  ;;  %18 = vst [vmem:[#allocation2] sm:$0x1] %v17_v0 }
   0x3   :  { %4188 = sst [smem:[#allocation18_spill]] %s4183_s12 }
   0x4   :  { %19 = vsyncpa [#allocation5], 0 }
   0x5   :  { %21 = vsyncpa [#allocation5 + $0x1], 0 }
   0x6   :  { %22 = vsyncpa [#allocation7], 0 }
   0x7   :  { %23 = vsyncpa [#allocation10], 0  ;;  %s3360_s23 = smov 0   ;;  %s3362_s24 = smov 0  }
   0x8   :  { %s3364_s25 = smov 0   ;;  %s3366_s26 = smov 0  }
   0x9 LB: > { %s3379_s11 = sadd.s32 4294967295, %s3280_s26   ;;  %s3382_s27 = sadd.s32 1, %s3280_s26   ;;  %s3280_s26 = sphi %s3366_s26, %s4198_s26   ;;  %s3276_s25 = sphi %s3364_s25, %s4202_s25   ;;  %s3272_s24 = sphi %s3362_s24, %s4201_s24   ;;  %s3268_s23 = sphi %s3360_s23, %s4200_s23  }
   0xa   : > { %4189 = sst [smem:[#allocation14_spill]] %s3382_s27  ;;  %s33_s28 = ssub.s32 %s3280_s26, %s3382_s27 }
   0xb   : > { %s36_s29 = sadd.s32 1, %s3276_s25  ;;  %p34_p0 = scmp.eq.s32.totalorder %s33_s28, 0 }
   0xc   : > { %p43_p1 = scmp.ne.s32.totalorder %s3276_s25, %s3272_s24  ;;  %p44_p2 = scmp.eq.s32.totalorder %s3280_s26, 0 }
   0xd   : > { %p101_p3 = scmp.ne.s32.totalorder %s3272_s24, %s3268_s23  ;;  %p102_p5 = scmp.eq.s32.totalorder %s3379_s11, 0 }
   0xe   : > { %s3392_s30 = scalar_select %p34_p0, %s3276_s25, %s36_s29  }
   0xf   : > { %p3394_p4 = por %p44_p2, %p43_p1  ;;  %p2767_p6 = scmp.ge.s32.totalorder %s3280_s26, 1 }
  0x10   : > { %4190 = sst [smem:[#allocation15_spill]] %s3392_s30  ;;  %p332_p7 = scmp.lt.s32.totalorder %s3280_s26, 3 }
  0x11   : > { %p3403_p8 = por %p102_p5, %p101_p3  ;;  %s4194_s5 = sld [smem:[#allocation16_spill]] }
  0x12   : > { %p3407_p9 = pnand %p2767_p6, %p332_p7  ;;  %s3282_s19 = smov [#allocation6]  }
  0x13   : > { %s348_s20 = sshll.u32 %s3282_s19, 4  ;;  %s4196_s8 = sld [smem:[#allocation17_spill]]  ;;  %s349_s20 = int_to_ptr.vmem [resolvable:$true] %s348_s20 }
  0x14   : > { %p2930_p10 = pneg %p3407_p9  ;;  %s3283_s29 = smov 384  }
  0x15   : > { %s3284_s16 = smov 24   ;;  %s3285_s17 = smov [#allocation8]  }
  0x16   : > { %p3418_p11 = pnand %p2930_p10, %p102_p5  ;;  %s368_s19 = sshll.u32 %s3285_s17, 4  ;;  %s369_s19 = int_to_ptr.vmem [resolvable:$true] %s368_s19 }
  0x17   : > { %s346_s18 = sshll.u32 %s4194_s5, 4  ;;  %s3286_s5 = smov 128   ;;  %s347_s18 = int_to_ptr.hbm [resolvable:$true] %s346_s18 }
  0x18   : > { %2933 = dma.hbm_to_vmem [thread:$0]  (!%p3418_p11), %s347_s18, 1536, %s349_s20, [#allocation7], %s3283_s29, %s3283_s29, %s3284_s16  }
  0x19   : > { %s366_s28 = sshll.u32 %s4196_s8, 4  ;;  %s3287_s30 = smov 8   ;;  %s367_s28 = int_to_ptr.hbm [resolvable:$true] %s366_s28 }
  0x1a   : > { %2936 = dma.hbm_to_vmem [thread:$0]  (!%p3418_p11), %s367_s28, 512, %s369_s19, [#allocation7], %s3286_s5, %s3286_s5, %s3287_s30  }
  0x1b   : > { %s380_s22 = sshll.u32 %s4180_s9, 4  ;;  %s3288_s23 = smov [#allocation9]   ;;  %s381_s22 = int_to_ptr.hbm [resolvable:$true] %s380_s22 }
  0x1c   : > { %s382_s8 = sshll.u32 %s3288_s23, 4  ;;  %p2771_p12 = scmp.ge.s32.totalorder %s3280_s26, 2  ;;  %s383_s8 = int_to_ptr.vmem [resolvable:$true] %s382_s8 }
  0x1d   : > { %2939 = dma.hbm_to_vmem [thread:$0]  (!%p3418_p11), %s381_s22, 512, %s383_s8, [#allocation10], %s3286_s5, %s3286_s5, %s3287_s30  }
  0x1e   : > { %398 = sbr.rel (%p2771_p12) target bundleno = 64 (0x40), region = 48 }
  0x23   : > { %401 = sbr.rel (!%p3394_p4) target bundleno = 47 (0x2f), region = 52  ;;  %s403_s18 = sand.u32 (%p3394_p4), 1, %s3276_s25  }
  0x24   : > { %s2773_s20 = sshll.u32 (%p3394_p4), %s3280_s26, 3  ;;  %s2772_s28 = sshll.u32 (%p3394_p4), %s403_s18, 6 }
  0x25   : > { %s407_s27 = scalar_lea.vmem (%p3394_p4), %s4171_s0, %s2773_s20  ;;  %s405_s21 = scalar_lea.vmem (%p3394_p4), [#allocation3], %s2772_s28 }
  0x26   : > { %v450_v1 = vld [vmem:[%s407_s27] sm:$0xff] (%p3394_p4)  ;;  %v452_v2 = vld [vmem:[%s407_s27 + $0x10] sm:$0xff] (%p3394_p4) }
  0x27   : > { %v454_v3 = vld [vmem:[%s407_s27 + $0x20] sm:$0xff] (%p3394_p4)  ;;  %451 = vst [vmem:[%s405_s21] sm:$0xff] (%p3394_p4), %v450_v1  ;;  %v456_v4 = vld [vmem:[%s407_s27 + $0x30] sm:$0xff] (%p3394_p4) }
  0x28   : > { %453 = vst [vmem:[%s405_s21 + $0x8] sm:$0xff] %v452_v2  ;;  %v458_v5 = vld [vmem:[%s407_s27 + $0x40] sm:$0xff]  ;;  %v460_v6 = vld [vmem:[%s407_s27 + $0x50] sm:$0xff] }
  0x29   : > { %455 = vst [vmem:[%s405_s21 + $0x10] sm:$0xff] %v454_v3  ;;  %v462_v7 = vld [vmem:[%s407_s27 + $0x60] sm:$0xff]  ;;  %v464_v8 = vld [vmem:[%s407_s27 + $0x70] sm:$0xff] }
  0x2a   : > { %457 = vst [vmem:[%s405_s21 + $0x18] sm:$0xff] %v456_v4 }
  0x2b   : > { %459 = vst [vmem:[%s405_s21 + $0x20] sm:$0xff] %v458_v5 }
  0x2c   : > { %461 = vst [vmem:[%s405_s21 + $0x28] sm:$0xff] %v460_v6 }
  0x2d   : > { %463 = vst [vmem:[%s405_s21 + $0x30] sm:$0xff] %v462_v7 }
  0x2e   : > { %465 = vst [vmem:[%s405_s21 + $0x38] sm:$0xff] %v464_v8 }
  0x2f PF: > { %s479_s5 = sand.u32 1, %s3276_s25   ;;  %s2905_s8 = sshll.u32 %s3280_s26, 6 }
  0x30   : > { %s2774_s30 = sshll.u32 %s479_s5, 6  ;;  %s488_s19 = scalar_lea.hbm %s4173_s2, %s2905_s8 }
  0x31   : > { %s489_s22 = sshll.u32 %s488_s19, 4  ;;  %s483_s23 = scalar_lea.vmem [#allocation4], %s2774_s30  ;;  %s490_s22 = int_to_ptr.hbm [resolvable:$true] %s489_s22 }
  0x32   : > { %s491_s18 = sshll.u32 %s483_s23, 4  ;;  %s480_s20 = scalar_lea.sflag [#allocation5], %s479_s5  ;;  %s492_s18 = int_to_ptr.vmem [resolvable:$true] %s491_s18 }
  0x33   : > { %s3210_s28 = sshra.s32 %s490_s22, 4  ;;  %s3216_s27 = scalar_lea.hbm %s4173_s2, 128  ;;  %s3211_s28 = int_to_ptr.hbm [resolvable:$true] %s3210_s28 }
  0x34   : > { %s3212_s29 = scalar_lea.hbm %s3211_s28, 64  ;;  %p3217_p2 = scmp.lt.s32.totalorder %s3211_s28, %s4173_s2 }
  0x35   : > { %p3213_p13 = scmp.ne.s32.totalorder %s3211_s28, %s3212_s29  ;;  %p3218_p3 = scmp.lt.s32.totalorder %s3216_s27, %s3212_s29 }
  0x37   : > { %p3214_p0 = pnand %p3213_p13, %p3394_p4  ;;  %p3219_p6 = por %p3218_p3, %p3217_p2 }
  0x39   : > { %p3215_p1 = pneg %p3214_p0 }
  0x3b   : > { %p3220_p7 = pnand %p3219_p6, %p3215_p1 }
  0x3d   : > { %3223 = shalt.err (!%p3220_p7)
}
  0x3e   : > { %s3289_s5 = smov 128   ;;  %s3290_s8 = smov 8  }
  0x3f   : > { %2922 = dma.hbm_to_vmem [thread:$0]  (%p3394_p4), %s490_s22, 1024, %s492_s18, %s480_s20, %s3289_s5, %s3289_s5, %s3290_s8  }
  0x40 PF: > { %512 = sbr.rel (%p3407_p9) target bundleno = 2357 (0x935), region = 102  ;;  %s515_s30 = sand.u32 (!%p3407_p9), 1, %s3272_s24  }
  0x41   : > { %s2778_s17 = sshll.u32 (!%p3407_p9), %s515_s30, 6  ;;  %s522_s23 = scalar_lea.sflag (!%p3407_p9), [#allocation5], %s515_s30 }
  0x42   : > { %s3460_s19 = scalar_lea.vmem (!%p3407_p9), [#allocation3], %s2778_s17  ;;  %s3462_s28 = scalar_lea.vmem (!%p3407_p9), [#allocation4], %s2778_s17 }
  0x45   : > { %3255 = dma.done.wait (%p3403_p8), %s522_s23, 1024  }
  0x46   : > { %3257 = vsyncadd (%p3403_p8), %s522_s23, 4294966272 }
  0x47   : > { %3259 = dma.done.wait (%p102_p5), [#allocation7], 2048  }
  0x48   : > { %3261 = vsyncadd (%p102_p5), [#allocation7], 4294965248 }
  0x49   : > { %3263 = dma.done.wait (%p102_p5), [#allocation10], 512  }
  0x4a   : > { %3265 = vsyncadd (%p102_p5), [#allocation10], 4294966784  ;;  %v2909_v9 = vld [vmem:[%s4175_s4 + $0x1c] sm:$0xf]  ;;  %v2803_v10 = vld [vmem:[%s4175_s4 + $0x24] sm:$0xf0] }
  0x4b   : > { %v2906_v11 = vld [vmem:[%s4175_s4 + $0x4] sm:$0xf]  ;;  %v2806_v12 = vor.u32 %v2909_v9, %v2803_v10  ;;  %v2791_v13 = vld [vmem:[%s4175_s4 + $0xc] sm:$0xf0]  ;;  %v2801_v17 = vld [vmem:[%s4175_s4 + $0x18] sm:$0xf] }
  0x4c   : > { %v2794_v14 = vor.u32 %v2906_v11, %v2791_v13  ;;  %v614_v15 = vld [vmem:[%s3460_s19 + $0x20] sm:$0xff]  ;;  %v615_v16 = vld [vmem:[%s3460_s19 + $0x28] sm:$0xff]  ;;  %vm670_vm0 = vcmask 261120   ;;  %v3513_v27 = vld [vmem:[#allocation6 + $0x30] sm:$0xff]  ;;  %p594_p4 = scmp.lt.s32.totalorder %s3379_s11, 1  ;;  %s4197_s20 = sld [smem:[#allocation18_spill]] }
  0x4d   : > { %2914 = vmatpush.bf16.msra.mxu3 %v2806_v12  ;;  %718 = vmatpush.bf16.msra.mxu1 %v2806_v12  ;;  %v2910_v18 = vld [vmem:[%s4175_s4 + $0x20] sm:$0xf0]  ;;  %v2789_v19 = vld [vmem:[%s4175_s4] sm:$0xf]  ;;  %v2907_v20 = vld [vmem:[%s4175_s4 + $0x8] sm:$0xf0]  ;;  %v3504_v23 = vpack.c.bf16 %v615_v16, %v614_v15 }
  0x4e   : > { %v3502_v21 = vld [vmem:[#allocation6 + $0x48] sm:$0xff]  ;;  %v2802_v22 = vor.u32 %v2910_v18, %v2801_v17  ;;  %v2809_v24 = vld [vmem:[%s4175_s4 + $0x20] sm:$0xf]  ;;  %v2790_v26 = vor.u32 %v2907_v20, %v2789_v19  ;;  %v3526_v34 = vld [vmem:[#allocation6 + $0x50] sm:$0xff]  ;;  %s3581_s12 = scalar_select %p594_p4, %s3379_s11, 1 }
  0x4f   : > { %v2911_v25 = vld [vmem:[%s4175_s4 + $0x28] sm:$0xf0]  ;;  %v610_v28 = vld [vmem:[%s3460_s19] sm:$0xff]  ;;  %v3519_v31 = vld [vmem:[#allocation6 + $0x18] sm:$0xff] }
  0x50   : > { %2912 = vmatpush.bf16.msra.mxu2 %v2802_v22  ;;  %689 = vmatpush.bf16.msra.mxu0 %v2802_v22  ;;  %v611_v29 = vld [vmem:[%s3460_s19 + $0x8] sm:$0xff]  ;;  %v2810_v30 = vor.u32 %v2911_v25, %v2809_v24  ;;  %v3523_v33 = vld [vmem:[#allocation6] sm:$0xff]  ;;  %v3534_v35 = vld [vmem:[#allocation6 + $0x38] sm:$0xff]  ;;  %s2783_s26 = sshll.u32 %s3581_s12, 3 }
  0x51   : > { %2915 = vmatpush.bf16.msra.mxu3 %v2794_v14  ;;  %719 = vmatpush.bf16.msra.mxu1 %v2794_v14  ;;  %v618_v32 = vpack.c.bf16 %v611_v29, %v610_v28  ;;  %v3538_v36 = vld [vmem:[#allocation6 + $0x20] sm:$0xff]  ;;  %v2908_v38 = vld [vmem:[%s4175_s4 + $0x10] sm:$0xf0]  ;;  %v3547_v39 = vld [vmem:[#allocation6 + $0x58] sm:$0xff]  ;;  %s597_s16 = scalar_lea.vmem %s4172_s1, %s2783_s26 }
  0x52   : > { %v2797_v37 = vld [vmem:[%s4175_s4 + $0x8] sm:$0xf]  ;;  %v616_v40 = vld [vmem:[%s3460_s19 + $0x30] sm:$0xff]  ;;  %v617_v41 = vld [vmem:[%s3460_s19 + $0x38] sm:$0xff]  ;;  %s608_s29 = scalar_lea.vmem %s4197_s20, %s2783_s26 }
  0x53   : > { %v3552_v42 = vld [vmem:[#allocation6 + $0x8] sm:$0xff]  ;;  %v2798_v43 = vor.u32 %v2908_v38, %v2797_v37  ;;  %v3557_v44 = vld [vmem:[#allocation6 + $0x40] sm:$0xff]  ;;  %v3560_v45 = vpack.c.bf16 %v617_v41, %v616_v40  ;;  %v3568_v47 = vld [vmem:[#allocation6 + $0x10] sm:$0xff] }
  0x54   : > { %2817 = vmatmul.msk.bf16.vlgmr.msra.gmra.mxu3 %vm670_vm0, %v3504_v23  ;;  %2913 = vmatpush.bf16.msra.mxu2 %v2790_v26  ;;  %v3563_v46 = vld [vmem:[#allocation6 + $0x28] sm:$0xff]  ;;  %v3594_v48 = vld [vmem:[%s597_s16] sm:$0xff] }
  0x55   : > { %806 = vmatpush.msrb.mxu3 %v3502_v21  ;;  %1136 = vmatpush.msrb.mxu1 %v3502_v21  ;;  %v630_v54 = vld [vmem:[%s4177_s6] sm:$0x7] }
  0x56   : > { %690 = vmatpush.bf16.msra.mxu0 %v2790_v26  ;;  %2815 = vmatmul.msk.bf16.vlgmr.msra.gmra.mxu1 %vm670_vm0, %v618_v32  ;;  %v782_v55 = vld [vmem:[%s4178_s7] sm:$0x7]  ;;  %v3635_v56 = vperm.slane %v630_v54, 0  ;;  %v3643_v0 = vperm.slane %v630_v54, 1  ;;  %v3655_v22 = vperm.slane %v630_v54, 2 }
  0x57   : > { %807 = vmatpush.msrb.mxu3 %v3513_v27  ;;  %2813 = vmatmul.msk.bf16.vlgmr.msra.gmra.mxu2 %vm670_vm0, %v3504_v23  ;;  %v3637_v57 = vperm.slane %v782_v55, 0  ;;  %v3645_v2 = vperm.slane %v782_v55, 1  ;;  %v3653_v17 = vperm.slane %v782_v55, 2 }
  0x58   : > { %747 = vmatpush.bf16.msrb.mxu2 %v2810_v30  ;;  %1137 = vmatpush.msrb.mxu1 %v3513_v27 }
  0x59   : > { %808 = vmatpush.msrb.mxu3 %v3519_v31  ;;  %2811 = vmatmul.msk.bf16.vlgmr.msra.gmra.mxu0 %vm670_vm0, %v618_v32 }
  0x5a   : > { %1138 = vmatpush.msrb.mxu1 %v3519_v31  ;;  %1066 = vmatpush.msrb.mxu0 %v3547_v39 }
  0x5b   : > { %809 = vmatpush.msrb.mxu3 %v3523_v33 }
  0x5c   : > { %1139 = vmatpush.msrb.mxu1 %v3523_v33  ;;  %748 = vmatpush.bf16.msrb.mxu2 %v2798_v43 }
  0x5d   : > { %826 = vmatpush.msra.mxu3 %v3526_v34  ;;  %1067 = vmatpush.msrb.mxu0 %v3557_v44 }
  0x5e   : > { %1266 = vmatpush.msra.mxu1 %v3526_v34 }
  0x5f   : > { %827 = vmatpush.msra.mxu3 %v3534_v35  ;;  %1068 = vmatpush.msrb.mxu0 %v3563_v46 }
  0x60   : > { %1156 = vmatpush.msra.mxu2 %v3526_v34  ;;  %1267 = vmatpush.msra.mxu1 %v3534_v35 }
  0x61   : > { %828 = vmatpush.msra.mxu3 %v3538_v36  ;;  %1069 = vmatpush.msrb.mxu0 %v3568_v47 }
  0x62   : > { %1157 = vmatpush.msra.mxu2 %v3534_v35  ;;  %1268 = vmatpush.msra.mxu1 %v3538_v36 }
  0x63   : > { %829 = vmatpush.msra.mxu3 %v3552_v42  ;;  %1246 = vmatpush.msra.mxu0 %v3502_v21 }
  0x64   : > { %2818 = vmatmul.msk.bf16.gmra.mxu3 %vm670_vm0, %v3560_v45  ;;  %1158 = vmatpush.msra.mxu2 %v3538_v36 }
  0x65   : > { %1269 = vmatpush.msra.mxu1 %v3552_v42  ;;  %1247 = vmatpush.msra.mxu0 %v3513_v27 }
  0x66   : > { %1159 = vmatpush.msra.mxu2 %v3552_v42 }
  0x67   : > { %2814 = vmatmul.msk.bf16.gmra.mxu2 %vm670_vm0, %v3560_v45  ;;  %1248 = vmatpush.msra.mxu0 %v3519_v31 }
  0x69   : > { %1249 = vmatpush.msra.mxu0 %v3523_v33 }
  0x74   : > { %2823 = vmatmul.msk.f32.vlgmr.msrb.gmra.mxu3 %vm670_vm0, %v3594_v48 }
  0x75   : > { %846 = vmatpush.msrb.mxu3 %v3547_v39 }
  0x77   : > { %847 = vmatpush.msrb.mxu3 %v3557_v44  ;;  %2819 = vmatmul.msk.bf16.vlgmr.msrb.gmra.mxu2 %vm670_vm0, %v618_v32 }
  0x78   : > { %1286 = vmatpush.msrb.mxu2 %v3547_v39 }
  0x79   : > { %848 = vmatpush.msrb.mxu3 %v3563_v46 }
  0x7a   : > { %1287 = vmatpush.msrb.mxu2 %v3557_v44 }
  0x7b   : > { %849 = vmatpush.msrb.mxu3 %v3568_v47 }
  0x7c   : > { %2824 = vmatmul.msk.f32.vlgmr.msra.gmra.mxu3 %vm670_vm0, %v3594_v48  ;;  %1288 = vmatpush.msrb.mxu2 %v3563_v46 }
  0x7d   : > { %916 = vmatpush.msra.mxu3 %v3502_v21 }
  0x7e   : > { %1289 = vmatpush.msrb.mxu2 %v3568_v47 }
  0x7f   : > { %917 = vmatpush.msra.mxu3 %v3513_v27 }
  0x81   : > { %918 = vmatpush.msra.mxu3 %v3519_v31 }
  0x83   : > { %919 = vmatpush.msra.mxu3 %v3523_v33 }
  0x84   : > { %2825 = vmatmul.msk.f32.vlgmr.msrb.gmra.mxu3 %vm670_vm0, %v3594_v48 }
  0x85   : > { %936 = vmatpush.msrb.mxu3 %v3526_v34 }
  0x87   : > { %937 = vmatpush.msrb.mxu3 %v3534_v35 }
  0x89   : > { %938 = vmatpush.msrb.mxu3 %v3538_v36 }
  0x8b   : > { %939 = vmatpush.msrb.mxu3 %v3552_v42 }
  0xd3   : > { %v721_v3 = vpop.f32.mrf.mxu1 }
  0xd4   : > { %v722_v4 = vadd.f32 %v721_v3, %v3643_v0 }
  0xd6   : > { %v692_v58 = vpop.f32.mrf.mxu0 }
  0xd7   : > { %v3619_v49 = vpop.f32.mrf.mxu3  ;;  %v693_v59 = vadd.f32 %v692_v58, %v3635_v56 }
  0xda   : > { %v3625_v52 = vpop.f32.mrf.mxu2 }
  0xdf   : > { %v3621_v50 = vpop.f32.mrf.mxu3 }
  0xe2   : > { %v3640_v60 = vpop.f32.mrf.mxu2 }
  0xe7   : > { %v3623_v51 = vpop.f32.mrf.mxu3 }
  0xea   : > { %v3649_v7 = vpop.f32.mrf.mxu2 }
  0xef   : > { %v3627_v53 = vpop.f32.mrf.mxu3 }
  0xf2   : > { %v3651_v12 = vpop.f32.mrf.mxu2 }
  0xf7   : > { %v811_v61 = vpop.f32.mrf.mxu3 }
  0xf8   : > { %v812_v62 = vadd.f32 %v811_v61, %v3637_v57 }
  0xfa   : > { %v854_v63 = vadd.f32 %v812_v62, %v693_v59  ;;  %v750_v30 = vpop.f32.mrf.mxu2 }
  0xfb   : > { %v751_v38 = vadd.f32 %v750_v30, %v3655_v22 }
  0xfc   : > { %v2826_v1 = vmul.f32 -1.442695, %v854_v63 }
  0xfe   : > { %2992 = vpow2.f32 %v2826_v1 }
  0xff   : > { %v831_v5 = vpop.f32.mrf.mxu3 }
 0x100   : > { %v832_v6 = vadd.f32 %v831_v5, %v3645_v2 }
 0x102   : > { %v874_v8 = vadd.f32 %v832_v6, %v722_v4 }
 0x104   : > { %v2993_v9 = vpop.eup %2992  ;;  %v2827_v10 = vmul.f32 -1.442695, %v874_v8 }
 0x105   : > { %v858_v11 = vadd.f32 1.0, %v2993_v9 }
 0x106   : > { %2994 = vpow2.f32 %v2827_v10  ;;  %v613_v10 = vld [vmem:[%s3460_s19 + $0x18] sm:$0xff] }
 0x107   : > { %2996 = vrcp.f32 %v858_v11  ;;  %v851_v19 = vpop.f32.mrf.mxu3  ;;  %v870_v20 = vand.u32 2147483648, %v858_v11  ;;  %v868_v25 = vand.u32 2147483647, %v858_v11  ;;  %vm864_vm2 = vweird.f32 %v858_v11 }
 0x108   : > { %v852_v26 = vadd.f32 %v851_v19, %v3653_v17 }
 0x109   : > { %v871_v32 = vor.u32 1.1754944e-38, %v870_v20  ;;  %vm869_vm4 = vcmp.eq.f32.partialorder %v868_v25, 8.507059e+37  ;;  %v723_v20 = vpop.f32.mrf.mxu1 }
 0x10a   : > { %v724_v25 = vadd.f32 %v723_v20, %v3643_v0 }
 0x10c   : > { %v2995_v13 = vpop.eup %2994 }
 0x10d   : > { %v2997_v14 = vpop.eup %2996  ;;  %v878_v15 = vadd.f32 1.0, %v2995_v13 }
 0x10e   : > { %v860_v16 = vmul.f32 %v2997_v14, %v858_v11  ;;  %vm865_vm1 = vweird.f32 %v2997_v14  ;;  %v694_v11 = vpop.f32.mrf.mxu0 }
 0x10f   : > { %2998 = vrcp.f32 %v878_v15  ;;  %vm866_vm3 = vmor %vm864_vm2, %vm865_vm1  ;;  %v890_v55 = vand.u32 2147483648, %v878_v15  ;;  %v888_v59 = vand.u32 2147483647, %v878_v15  ;;  %vm884_vm6 = vweird.f32 %v878_v15 }
 0x110   : > { %v861_v18 = vsub.f32 1.0, %v860_v16 }
 0x111   : > { %v891_v63 = vor.u32 1.1754944e-38, %v890_v55  ;;  %vm889_vm8 = vcmp.eq.f32.partialorder %v888_v59, 8.507059e+37 }
 0x112   : > { %v862_v24 = vmul.f32 %v2997_v14, %v861_v18 }
 0x114   : > { %v863_v28 = vadd.f32 %v2997_v14, %v862_v24 }
 0x115   : > { %v2999_v29 = vpop.eup %2998 }
 0x116   : > { %v880_v37 = vmul.f32 %v2999_v29, %v878_v15  ;;  %v867_v40 = vsel %vm866_vm3, %v2997_v14, %v863_v28  ;;  %vm885_vm5 = vweird.f32 %v2999_v29  ;;  %v695_v15 = vadd.f32 %v694_v11, %v3635_v56 }
 0x117   : > { %v872_v41 = vsel %vm869_vm4, %v871_v32, %v867_v40  ;;  %vm886_vm7 = vmor %vm884_vm6, %vm885_vm5 }
 0x118   : > { %v881_v43 = vsub.f32 1.0, %v880_v37  ;;  %v894_v54 = vmul.f32 %v872_v41, %v852_v26 }
 0x11a   : > { %v882_v58 = vmul.f32 %v2999_v29, %v881_v43  ;;  %v895_v61 = vadd.f32 %v894_v54, %v751_v38 }
 0x11c   : > { %v883_v62 = vadd.f32 %v2999_v29, %v882_v58  ;;  %3000 = vtanh.f32 %v895_v61 }
 0x11e   : > { %v887_v1 = vsel %vm886_vm7, %v2999_v29, %v883_v62 }
 0x11f   : > { %v892_v3 = vsel %vm889_vm8, %v891_v63, %v887_v1  ;;  %v752_v63 = vpop.f32.mrf.mxu2 }
 0x120   : > { %v897_v4 = vsub.f32 1.0, %v892_v3  ;;  %v899_v8 = vmul.f32 %v892_v3, %v3594_v48  ;;  %v612_v48 = vld [vmem:[%s3460_s19 + $0x10] sm:$0xff]  ;;  %s2784_s19 = sshll.u32 %s3379_s11, 3 }
 0x121   : > { %v619_v13 = vpack.c.bf16 %v613_v10, %v612_v48  ;;  %p600_p5 = scmp.lt.s32.totalorder %s2784_s19, 15 }
 0x122   : > { %v3001_v5 = vpop.eup %3000 }
 0x123   : > { %v898_v6 = vmul.f32 %v3001_v5, %v897_v4  ;;  %2812 = vmatmul.msk.bf16.gmra.mxu0 %vm670_vm0, %v619_v13  ;;  %2816 = vmatmul.msk.bf16.gmra.mxu1 %vm670_vm0, %v619_v13  ;;  %s4204_s19 = smov (!%p600_p5, %s2784_s19), 15 }
 0x124   : > { %2820 = vmatmul.msk.bf16.gmra.mxu2 %vm670_vm0, %v619_v13 }
 0x125   : > { %v3660_v9 = vadd.f32 %v899_v8, %v898_v6  ;;  %v753_v6 = vadd.f32 %v752_v63, %v3655_v22 }
 0x127   : > { %2828 = vmatmul.msk.f32.vlgmr.msra.gmra.mxu3 %vm670_vm0, %v3660_v9 }
 0x128   : > { %956 = vmatpush.msra.mxu3 %v3547_v39 }
 0x12a   : > { %957 = vmatpush.msra.mxu3 %v3557_v44 }
 0x12c   : > { %958 = vmatpush.msra.mxu3 %v3563_v46 }
 0x12e   : > { %959 = vmatpush.msra.mxu3 %v3568_v47 }
 0x12f   : > { %2829 = vmatmul.msk.f32.vlgmr.msrb.gmra.mxu3 %vm670_vm0, %v3660_v9 }
 0x130   : > { %1026 = vmatpush.msrb.mxu3 %v3502_v21 }
 0x132   : > { %1027 = vmatpush.msrb.mxu3 %v3513_v27 }
 0x134   : > { %1028 = vmatpush.msrb.mxu3 %v3519_v31  ;;  %2821 = vmatmul.msk.bf16.gmra.mxu2 %vm670_vm0, %v3504_v23 }
 0x136   : > { %1029 = vmatpush.msrb.mxu3 %v3523_v33 }
 0x137   : > { %2830 = vmatmul.msk.f32.vlgmr.msra.gmra.mxu3 %vm670_vm0, %v3660_v9 }
 0x138   : > { %1046 = vmatpush.msra.mxu3 %v3526_v34 }
 0x13a   : > { %1047 = vmatpush.msra.mxu3 %v3534_v35 }
 0x13c   : > { %1048 = vmatpush.msra.mxu3 %v3538_v36 }
 0x13e   : > { %1049 = vmatpush.msra.mxu3 %v3552_v42 }
 0x144   : > { %2822 = vmatmul.msk.bf16.gmra.mxu2 %vm670_vm0, %v3560_v45 }
 0x1a0   : > { %v697_v45 = vpop.f32.mrf.mxu0 }
 0x1aa   : > { %v921_v14 = vpop.f32.mrf.mxu3 }
 0x1ab   : > { %v922_v16 = vadd.f32 %v921_v14, %v3637_v57 }
 0x1ad   : > { %v964_v18 = vadd.f32 %v922_v16, %v695_v15 }
 0x1af   : > { %v2831_v19 = vmul.f32 -1.442695, %v964_v18 }
 0x1b1   : > { %3002 = vpow2.f32 %v2831_v19 }
 0x1b2   : > { %v941_v24 = vpop.f32.mrf.mxu3 }
 0x1b3   : > { %v942_v26 = vadd.f32 %v941_v24, %v3645_v2 }
 0x1b5   : > { %v984_v28 = vadd.f32 %v942_v26, %v724_v25 }
 0x1b7   : > { %v3003_v29 = vpop.eup %3002  ;;  %v2832_v30 = vmul.f32 -1.442695, %v984_v28 }
 0x1b8   : > { %v968_v32 = vadd.f32 1.0, %v3003_v29  ;;  %v698_v29 = vadd.f32 %v697_v45, %v3635_v56 }
 0x1b9   : > { %3004 = vpow2.f32 %v2832_v30 }
 0x1ba   : > { %3006 = vrcp.f32 %v968_v32  ;;  %v980_v54 = vand.u32 2147483648, %v968_v32  ;;  %v978_v58 = vand.u32 2147483647, %v968_v32  ;;  %v961_v59 = vpop.f32.mrf.mxu3  ;;  %vm974_vm10 = vweird.f32 %v968_v32 }
 0x1bb   : > { %v962_v23 = vadd.f32 %v961_v59, %v3653_v17 }
 0x1bc   : > { %v981_v1 = vor.u32 1.1754944e-38, %v980_v54  ;;  %vm979_vm12 = vcmp.eq.f32.partialorder %v978_v58, 8.507059e+37 }
 0x1bf   : > { %v3005_v37 = vpop.eup %3004 }
 0x1c0   : > { %v3007_v38 = vpop.eup %3006  ;;  %v988_v40 = vadd.f32 1.0, %v3005_v37 }
 0x1c1   : > { %v970_v41 = vmul.f32 %v3007_v38, %v968_v32  ;;  %vm975_vm9 = vweird.f32 %v3007_v38 }
 0x1c2   : > { %3008 = vrcp.f32 %v988_v40  ;;  %vm976_vm11 = vmor %vm974_vm10, %vm975_vm9  ;;  %v1000_v10 = vand.u32 2147483648, %v988_v40  ;;  %v998_v13 = vand.u32 2147483647, %v988_v40  ;;  %vm994_vm14 = vweird.f32 %v988_v40 }
 0x1c3   : > { %v971_v43 = vsub.f32 1.0, %v970_v41 }
 0x1c4   : > { %v1001_v16 = vor.u32 1.1754944e-38, %v1000_v10  ;;  %vm999_vm1 = vcmp.eq.f32.partialorder %v998_v13, 8.507059e+37 }
 0x1c5   : > { %v972_v55 = vmul.f32 %v3007_v38, %v971_v43 }
 0x1c7   : > { %v973_v61 = vadd.f32 %v3007_v38, %v972_v55 }
 0x1c8   : > { %v3009_v62 = vpop.eup %3008 }
 0x1c9   : > { %v990_v3 = vmul.f32 %v3009_v62, %v988_v40  ;;  %v977_v4 = vsel %vm976_vm11, %v3007_v38, %v973_v61  ;;  %vm995_vm13 = vweird.f32 %v3009_v62  ;;  %v726_v40 = vpop.f32.mrf.mxu1 }
 0x1ca   : > { %v982_v5 = vsel %vm979_vm12, %v981_v1, %v977_v4  ;;  %vm996_vm15 = vmor %vm994_vm14, %vm995_vm13  ;;  %v727_v41 = vadd.f32 %v726_v40, %v3643_v0 }
 0x1cb   : > { %v991_v8 = vsub.f32 1.0, %v990_v3  ;;  %v1004_v48 = vmul.f32 %v982_v5, %v962_v23 }
 0x1cd   : > { %v992_v11 = vmul.f32 %v3009_v62, %v991_v8  ;;  %v1005_v14 = vadd.f32 %v1004_v48, %v753_v6 }
 0x1cf   : > { %v993_v15 = vadd.f32 %v3009_v62, %v992_v11  ;;  %3010 = vtanh.f32 %v1005_v14  ;;  %v755_v14 = vpop.f32.mrf.mxu2 }
 0x1d1   : > { %v997_v18 = vsel %vm996_vm15, %v3009_v62, %v993_v15  ;;  %v3720_v62 = vpop.f32.mrf.mxu0 }
 0x1d2   : > { %v1002_v19 = vsel %vm999_vm1, %v1001_v16, %v997_v18  ;;  %v756_v18 = vadd.f32 %v755_v14, %v3655_v22 }
 0x1d3   : > { %v1007_v20 = vsub.f32 1.0, %v1002_v19  ;;  %v1009_v26 = vmul.f32 %v1002_v19, %v3660_v9 }
 0x1d5   : > { %v3011_v24 = vpop.eup %3010 }
 0x1d6   : > { %v1008_v25 = vmul.f32 %v3011_v24, %v1007_v20 }
 0x1d8   : > { %v3696_v28 = vadd.f32 %v1009_v26, %v1008_v25 }
 0x1da   : > { %2833 = vmatmul.msk.f32.vlgmr.msrb.gmra.mxu3 %vm670_vm0, %v3696_v28  ;;  %2835 = vmatmul.msk.f32.vlgmr.msrb.gmra.mxu0 %vm670_vm0, %v3696_v28 }
 0x1db   : > { %1176 = vmatpush.msrb.mxu3 %v3547_v39  ;;  %1376 = vmatpush.msrb.mxu0 %v3526_v34 }
 0x1dd   : > { %1177 = vmatpush.msrb.mxu3 %v3557_v44  ;;  %1377 = vmatpush.msrb.mxu0 %v3534_v35 }
 0x1df   : > { %1178 = vmatpush.msrb.mxu3 %v3563_v46  ;;  %1378 = vmatpush.msrb.mxu0 %v3538_v36 }
 0x1e1   : > { %1179 = vmatpush.msrb.mxu3 %v3568_v47  ;;  %1379 = vmatpush.msrb.mxu0 %v3552_v42 }
 0x1e2   : > { %2834 = vmatmul.msk.f32.vlgmr.msra.gmra.mxu3 %vm670_vm0, %v3696_v28 }
 0x1e3   : > { %1356 = vmatpush.msra.mxu3 %v3502_v21 }
 0x1e5   : > { %1357 = vmatpush.msra.mxu3 %v3513_v27 }
 0x1e7   : > { %1358 = vmatpush.msra.mxu3 %v3519_v31 }
 0x1e9   : > { %1359 = vmatpush.msra.mxu3 %v3523_v33 }
 0x257   : > { %v1071_v6 = vpop.f32.mrf.mxu0 }
 0x258   : > { %v1072_v13 = vadd.f32 %v1071_v6, %v3653_v17 }
 0x25d   : > { %v1031_v30 = vpop.f32.mrf.mxu3 }
 0x25e   : > { %v1032_v32 = vadd.f32 %v1031_v30, %v3637_v57 }
 0x260   : > { %v1074_v37 = vadd.f32 %v1032_v32, %v698_v29 }
 0x262   : > { %v2836_v38 = vmul.f32 -1.442695, %v1074_v37 }
 0x264   : > { %3012 = vpow2.f32 %v2836_v38 }
 0x265   : > { %v1051_v43 = vpop.f32.mrf.mxu3 }
 0x266   : > { %v1052_v54 = vadd.f32 %v1051_v43, %v3645_v2 }
 0x268   : > { %v1094_v55 = vadd.f32 %v1052_v54, %v727_v41 }
 0x26a   : > { %v3013_v58 = vpop.eup %3012  ;;  %v2837_v59 = vmul.f32 -1.442695, %v1094_v55 }
 0x26b   : > { %v1078_v61 = vadd.f32 1.0, %v3013_v58 }
 0x26c   : > { %3014 = vpow2.f32 %v2837_v59  ;;  %v757_v59 = vpop.f32.mrf.mxu2 }
 0x26d   : > { %3016 = vrcp.f32 %v1078_v61  ;;  %v1090_v5 = vand.u32 2147483648, %v1078_v61  ;;  %v1088_v48 = vand.u32 2147483647, %v1078_v61  ;;  %vm1084_vm3 = vweird.f32 %v1078_v61 }
 0x26f   : > { %v1091_v15 = vor.u32 1.1754944e-38, %v1090_v5  ;;  %vm1089_vm5 = vcmp.eq.f32.partialorder %v1088_v48, 8.507059e+37  ;;  %v700_v5 = vadd.f32 %v3720_v62, %v3635_v56 }
 0x272   : > { %v3015_v63 = vpop.eup %3014 }
 0x273   : > { %v3017_v1 = vpop.eup %3016  ;;  %v1098_v3 = vadd.f32 1.0, %v3015_v63 }
 0x274   : > { %v1080_v23 = vmul.f32 %v3017_v1, %v1078_v61  ;;  %vm1085_vm2 = vweird.f32 %v3017_v1  ;;  %v3745_v61 = vpop.f32.mrf.mxu2 }
 0x275   : > { %3018 = vrcp.f32 %v1098_v3  ;;  %vm1086_vm4 = vmor %vm1084_vm3, %vm1085_vm2  ;;  %v1110_v26 = vand.u32 2147483648, %v1098_v3  ;;  %v1108_v29 = vand.u32 2147483647, %v1098_v3  ;;  %vm1104_vm7 = vweird.f32 %v1098_v3 }
 0x276   : > { %v1081_v4 = vsub.f32 1.0, %v1080_v23 }
 0x277   : > { %v1111_v37 = vor.u32 1.1754944e-38, %v1110_v26  ;;  %vm1109_vm9 = vcmp.eq.f32.partialorder %v1108_v29, 8.507059e+37 }
 0x278   : > { %v1082_v8 = vmul.f32 %v3017_v1, %v1081_v4 }
 0x27a   : > { %v1083_v10 = vadd.f32 %v3017_v1, %v1082_v8 }
 0x27b   : > { %v3019_v11 = vpop.eup %3018 }
 0x27c   : > { %v1100_v16 = vmul.f32 %v3019_v11, %v1098_v3  ;;  %v1087_v19 = vsel %vm1086_vm4, %v3017_v1, %v1083_v10  ;;  %vm1105_vm6 = vweird.f32 %v3019_v11  ;;  %v3747_v63 = vpop.f32.mrf.mxu2  ;;  %v728_v3 = vpop.f32.mrf.mxu1 }
 0x27d   : > { %v1092_v20 = vsel %vm1089_vm5, %v1091_v15, %v1087_v19  ;;  %vm1106_vm8 = vmor %vm1104_vm7, %vm1105_vm6 }
 0x27e   : > { %v1101_v24 = vsub.f32 1.0, %v1100_v16  ;;  %v1114_v25 = vmul.f32 %v1092_v20, %v1072_v13 }
 0x280   : > { %v1102_v45 = vmul.f32 %v3019_v11, %v1101_v24  ;;  %v1115_v30 = vadd.f32 %v1114_v25, %v756_v18 }
 0x282   : > { %v1103_v32 = vadd.f32 %v3019_v11, %v1102_v45  ;;  %3020 = vtanh.f32 %v1115_v30 }
 0x284   : > { %v1107_v38 = vsel %vm1106_vm8, %v3019_v11, %v1103_v32  ;;  %v3749_v1 = vpop.f32.mrf.mxu2  ;;  %v729_v11 = vadd.f32 %v728_v3, %v3643_v0 }
 0x285   : > { %v1112_v40 = vsel %vm1109_vm9, %v1111_v37, %v1107_v38 }
 0x286   : > { %v1117_v41 = vsub.f32 1.0, %v1112_v40  ;;  %v1119_v55 = vmul.f32 %v1112_v40, %v3696_v28 }
 0x288   : > { %v3021_v43 = vpop.eup %3020 }
 0x289   : > { %v1118_v54 = vmul.f32 %v3021_v43, %v1117_v41 }
 0x28b   : > { %v3725_v58 = vadd.f32 %v1119_v55, %v1118_v54  ;;  %v758_v55 = vadd.f32 %v757_v59, %v3655_v22 }
 0x28c   : > { %v3751_v23 = vpop.f32.mrf.mxu2 }
 0x28d   : > { %2838 = vmatmul.msk.f32.vlgmr.msrb.gmra.mxu1 %vm670_vm0, %v3725_v58  ;;  %2839 = vmatmul.msk.f32.vlgmr.msra.gmra.mxu2 %vm670_vm0, %v3725_v58 }
 0x28e   : > { %2840 = vmatmul.msk.f32.vlgmr.msrb.gmra.mxu3 %vm670_vm0, %v3725_v58  ;;  %1396 = vmatpush.msrb.mxu1 %v3547_v39 }
 0x28f   : > { %1466 = vmatpush.msra.mxu2 %v3502_v21  ;;  %1486 = vmatpush.msrb.mxu3 %v3526_v34 }
 0x290   : > { %1397 = vmatpush.msrb.mxu1 %v3557_v44 }
 0x291   : > { %1467 = vmatpush.msra.mxu2 %v3513_v27  ;;  %1487 = vmatpush.msrb.mxu3 %v3534_v35 }
 0x292   : > { %1398 = vmatpush.msrb.mxu1 %v3563_v46 }
 0x293   : > { %1468 = vmatpush.msra.mxu2 %v3519_v31  ;;  %1488 = vmatpush.msrb.mxu3 %v3538_v36 }
 0x294   : > { %1399 = vmatpush.msrb.mxu1 %v3568_v47 }
 0x295   : > { %1469 = vmatpush.msra.mxu2 %v3523_v33  ;;  %1489 = vmatpush.msrb.mxu3 %v3552_v42 }
 0x30a   : > { %v1141_v4 = vpop.f32.mrf.mxu1 }
 0x30b   : > { %v1142_v6 = vadd.f32 %v1141_v4, %v3637_v57 }
 0x30d   : > { %v1184_v8 = vadd.f32 %v1142_v6, %v700_v5 }
 0x30f   : > { %v2841_v48 = vmul.f32 -1.442695, %v1184_v8 }
 0x310   : > { %v1161_v10 = vpop.f32.mrf.mxu2 }
 0x311   : > { %3022 = vpow2.f32 %v2841_v48  ;;  %v1162_v13 = vadd.f32 %v1161_v10, %v3645_v2  ;;  %v1181_v32 = vpop.f32.mrf.mxu3 }
 0x312   : > { %v1182_v43 = vadd.f32 %v1181_v32, %v3653_v17 }
 0x313   : > { %v1204_v14 = vadd.f32 %v1162_v13, %v729_v11 }
 0x315   : > { %v2842_v15 = vmul.f32 -1.442695, %v1204_v14 }
 0x317   : > { %v3023_v16 = vpop.eup %3022  ;;  %3024 = vpow2.f32 %v2842_v15 }
 0x318   : > { %v1188_v18 = vadd.f32 1.0, %v3023_v16 }
 0x31a   : > { %3026 = vrcp.f32 %v1188_v18  ;;  %v1200_v26 = vand.u32 2147483648, %v1188_v18  ;;  %v1198_v29 = vand.u32 2147483647, %v1188_v18  ;;  %vm1194_vm11 = vweird.f32 %v1188_v18 }
 0x31c   : > { %v1201_v40 = vor.u32 1.1754944e-38, %v1200_v26  ;;  %vm1199_vm13 = vcmp.eq.f32.partialorder %v1198_v29, 8.507059e+37 }
 0x31d   : > { %v3025_v19 = vpop.eup %3024 }
 0x31e   : > { %v1208_v20 = vadd.f32 1.0, %v3025_v19 }
 0x320   : > { %v3027_v24 = vpop.eup %3026  ;;  %3028 = vrcp.f32 %v1208_v20  ;;  %v1220_v5 = vand.u32 2147483648, %v1208_v20  ;;  %v1218_v8 = vand.u32 2147483647, %v1208_v20  ;;  %vm1214_vm15 = vweird.f32 %v1208_v20 }
 0x321   : > { %v1190_v62 = vmul.f32 %v3027_v24, %v1188_v18  ;;  %vm1195_vm10 = vweird.f32 %v3027_v24 }
 0x322   : > { %vm1196_vm12 = vmor %vm1194_vm11, %vm1195_vm10  ;;  %v1221_v11 = vor.u32 1.1754944e-38, %v1220_v5  ;;  %vm1219_vm2 = vcmp.eq.f32.partialorder %v1218_v8, 8.507059e+37 }
 0x323   : > { %v1191_v25 = vsub.f32 1.0, %v1190_v62 }
 0x325   : > { %v1192_v45 = vmul.f32 %v3027_v24, %v1191_v25 }
 0x326   : > { %v3029_v30 = vpop.eup %3028 }
 0x327   : > { %v1210_v37 = vmul.f32 %v3029_v30, %v1208_v20  ;;  %v1193_v38 = vadd.f32 %v3027_v24, %v1192_v45  ;;  %vm1215_vm14 = vweird.f32 %v3029_v30  ;;  %v732_v20 = vadd.f32 %v3619_v49, %v3643_v0 }
 0x328   : > { %vm1216_vm1 = vmor %vm1214_vm15, %vm1215_vm14 }
 0x329   : > { %v1211_v41 = vsub.f32 1.0, %v1210_v37  ;;  %v1197_v54 = vsel %vm1196_vm12, %v3027_v24, %v1193_v38 }
 0x32a   : > { %v1202_v3 = vsel %vm1199_vm13, %v1201_v40, %v1197_v54 }
 0x32b   : > { %v1212_v4 = vmul.f32 %v3029_v30, %v1211_v41  ;;  %v1224_v6 = vmul.f32 %v1202_v3, %v1182_v43 }
 0x32d   : > { %v1213_v48 = vadd.f32 %v3029_v30, %v1212_v4  ;;  %v1225_v10 = vadd.f32 %v1224_v6, %v758_v55 }
 0x32f   : > { %v1217_v13 = vsel %vm1216_vm1, %v3029_v30, %v1213_v48  ;;  %3030 = vtanh.f32 %v1225_v10  ;;  %v761_v48 = vadd.f32 %v3745_v61, %v3655_v22 }
 0x330   : > { %v1222_v14 = vsel %vm1219_vm2, %v1221_v11, %v1217_v13 }
 0x331   : > { %v1227_v15 = vsub.f32 1.0, %v1222_v14  ;;  %v1229_v59 = vmul.f32 %v1222_v14, %v3725_v58 }
 0x335   : > { %v3031_v16 = vpop.eup %3030 }
 0x336   : > { %v1228_v18 = vmul.f32 %v3031_v16, %v1227_v15 }
 0x338   : > { %v3761_v19 = vadd.f32 %v1229_v59, %v1228_v18 }
 0x33a   : > { %2843 = vmatmul.msk.f32.vlgmr.msra.gmra.mxu0 %vm670_vm0, %v3761_v19  ;;  %2844 = vmatmul.msk.f32.vlgmr.msra.gmra.mxu1 %vm670_vm0, %v3761_v19 }
 0x33b   : > { %2845 = vmatmul.msk.f32.vlgmr.msrb.gmra.mxu2 %vm670_vm0, %v3761_v19  ;;  %1506 = vmatpush.msra.mxu0 %v3547_v39 }
 0x33c   : > { %1576 = vmatpush.msra.mxu1 %v3502_v21  ;;  %1596 = vmatpush.msrb.mxu2 %v3526_v34 }
 0x33d   : > { %1507 = vmatpush.msra.mxu0 %v3557_v44 }
 0x33e   : > { %1577 = vmatpush.msra.mxu1 %v3513_v27  ;;  %1597 = vmatpush.msrb.mxu2 %v3534_v35  ;;  %v703_v27 = vadd.f32 %v3625_v52, %v3635_v56 }
 0x33f   : > { %1508 = vmatpush.msra.mxu0 %v3563_v46 }
 0x340   : > { %1578 = vmatpush.msra.mxu1 %v3519_v31  ;;  %1598 = vmatpush.msrb.mxu2 %v3538_v36 }
 0x341   : > { %1509 = vmatpush.msra.mxu0 %v3568_v47 }
 0x342   : > { %1579 = vmatpush.msra.mxu1 %v3523_v33  ;;  %1599 = vmatpush.msrb.mxu2 %v3552_v42 }
 0x3b7   : > { %v1251_v21 = vpop.f32.mrf.mxu0  ;;  %v1271_v34 = vpop.f32.mrf.mxu1 }
 0x3b8   : > { %v1252_v35 = vadd.f32 %v1251_v21, %v3637_v57  ;;  %v1272_v31 = vadd.f32 %v1271_v34, %v3645_v2 }
 0x3ba   : > { %v1294_v24 = vadd.f32 %v1252_v35, %v703_v27  ;;  %v1314_v36 = vadd.f32 %v1272_v31, %v732_v20  ;;  %v734_v35 = vadd.f32 %v3621_v50, %v3643_v0 }
 0x3bc   : > { %v2846_v62 = vmul.f32 -1.442695, %v1294_v24  ;;  %v2847_v25 = vmul.f32 -1.442695, %v1314_v36 }
 0x3be   : > { %3032 = vpow2.f32 %v2846_v62  ;;  %v1291_v54 = vpop.f32.mrf.mxu2 }
 0x3bf   : > { %3034 = vpow2.f32 %v2847_v25  ;;  %v1292_v4 = vadd.f32 %v1291_v54, %v3653_v17  ;;  %v705_v25 = vadd.f32 %v3640_v60, %v3635_v56 }
 0x3c4   : > { %v3033_v33 = vpop.eup %3032 }
 0x3c5   : > { %v3035_v42 = vpop.eup %3034  ;;  %v1298_v26 = vadd.f32 1.0, %v3033_v33 }
 0x3c6   : > { %v1318_v45 = vadd.f32 1.0, %v3035_v42 }
 0x3c7   : > { %3036 = vrcp.f32 %v1298_v26  ;;  %v1310_v38 = vand.u32 2147483648, %v1298_v26  ;;  %v1308_v41 = vand.u32 2147483647, %v1298_v26  ;;  %vm1304_vm4 = vweird.f32 %v1298_v26 }
 0x3c8   : > { %3038 = vrcp.f32 %v1318_v45  ;;  %v1330_v10 = vand.u32 2147483648, %v1318_v45  ;;  %vm1324_vm8 = vweird.f32 %v1318_v45  ;;  %v1328_v13 = vand.u32 2147483647, %v1318_v45 }
 0x3c9   : > { %v1311_v3 = vor.u32 1.1754944e-38, %v1310_v38  ;;  %vm1309_vm6 = vcmp.eq.f32.partialorder %v1308_v41, 8.507059e+37 }
 0x3ca   : > { %v1331_v16 = vor.u32 1.1754944e-38, %v1330_v10  ;;  %vm1329_vm10 = vcmp.eq.f32.partialorder %v1328_v13, 8.507059e+37 }
 0x3cd   : > { %v3037_v49 = vpop.eup %3036 }
 0x3ce   : > { %v3039_v29 = vpop.eup %3038  ;;  %v1300_v30 = vmul.f32 %v3037_v49, %v1298_v26  ;;  %vm1305_vm3 = vweird.f32 %v3037_v49 }
 0x3cf   : > { %v1320_v52 = vmul.f32 %v3039_v29, %v1318_v45  ;;  %vm1306_vm5 = vmor %vm1304_vm4, %vm1305_vm3  ;;  %vm1325_vm7 = vweird.f32 %v3039_v29 }
 0x3d0   : > { %v1301_v32 = vsub.f32 1.0, %v1300_v30  ;;  %vm1326_vm9 = vmor %vm1324_vm8, %vm1325_vm7 }
 0x3d1   : > { %v1321_v37 = vsub.f32 1.0, %v1320_v52 }
 0x3d2   : > { %v1302_v40 = vmul.f32 %v3037_v49, %v1301_v32 }
 0x3d3   : > { %v1322_v43 = vmul.f32 %v3039_v29, %v1321_v37 }
 0x3d4   : > { %v1303_v55 = vadd.f32 %v3037_v49, %v1302_v40 }
 0x3d5   : > { %v1323_v8 = vadd.f32 %v3039_v29, %v1322_v43 }
 0x3d6   : > { %v1307_v5 = vsel %vm1306_vm5, %v3037_v49, %v1303_v55 }
 0x3d7   : > { %v1312_v6 = vsel %vm1309_vm6, %v1311_v3, %v1307_v5  ;;  %v1327_v15 = vsel %vm1326_vm9, %v3039_v29, %v1323_v8  ;;  %v763_v5 = vadd.f32 %v3747_v63, %v3655_v22 }
 0x3d8   : > { %v1334_v11 = vmul.f32 %v1312_v6, %v1292_v4  ;;  %v1332_v18 = vsel %vm1329_vm10, %v1331_v16, %v1327_v15 }
 0x3d9   : > { %v1337_v59 = vsub.f32 1.0, %v1332_v18  ;;  %v1339_v20 = vmul.f32 %v1332_v18, %v3761_v19 }
 0x3da   : > { %v1335_v14 = vadd.f32 %v1334_v11, %v761_v48 }
 0x3dc   : > { %3040 = vtanh.f32 %v1335_v14 }
 0x3e2   : > { %v3041_v21 = vpop.eup %3040 }
 0x3e3   : > { %v1338_v34 = vmul.f32 %v3041_v21, %v1337_v59 }
 0x3e5   : > { %v3791_v27 = vadd.f32 %v1339_v20, %v1338_v34  ;;  %v737_v20 = vadd.f32 %v3623_v51, %v3643_v0 }
 0x3e7   : > { %2848 = vmatmul.msk.f32.vlgmr.msra.gmra.mxu3 %vm670_vm0, %v3791_v27  ;;  %2849 = vmatmul.msk.f32.vlgmr.msrb.gmra.mxu0 %vm670_vm0, %v3791_v27 }
 0x3e8   : > { %2850 = vmatmul.msk.f32.vlgmr.msrb.gmra.mxu1 %vm670_vm0, %v3791_v27  ;;  %1616 = vmatpush.msra.mxu3 %v3547_v39 }
 0x3ea   : > { %1617 = vmatpush.msra.mxu3 %v3557_v44 }
 0x3ec   : > { %1618 = vmatpush.msra.mxu3 %v3563_v46 }
 0x3ee   : > { %1619 = vmatpush.msra.mxu3 %v3568_v47 }
 0x464   : > { %v1381_v61 = vpop.f32.mrf.mxu0 }
 0x465   : > { %v1382_v31 = vadd.f32 %v1381_v61, %v3645_v2  ;;  %v1401_v40 = vpop.f32.mrf.mxu1  ;;  %v708_v61 = vadd.f32 %v3649_v7, %v3635_v56 }
 0x466   : > { %v1402_v54 = vadd.f32 %v1401_v40, %v3653_v17 }
 0x467   : > { %v1424_v24 = vadd.f32 %v1382_v31, %v734_v35 }
 0x469   : > { %v2852_v36 = vmul.f32 -1.442695, %v1424_v24 }
 0x46a   : > { %v1361_v62 = vpop.f32.mrf.mxu3 }
 0x46b   : > { %3042 = vpow2.f32 %v2852_v36  ;;  %v1362_v39 = vadd.f32 %v1361_v62, %v3637_v57 }
 0x46d   : > { %v1404_v44 = vadd.f32 %v1362_v39, %v705_v25 }
 0x46f   : > { %v2851_v33 = vmul.f32 -1.442695, %v1404_v44 }
 0x471   : > { %v3043_v46 = vpop.eup %3042  ;;  %3044 = vpow2.f32 %v2851_v33 }
 0x472   : > { %v1428_v47 = vadd.f32 1.0, %v3043_v46 }
 0x474   : > { %3046 = vrcp.f32 %v1428_v47  ;;  %v1440_v6 = vand.u32 2147483648, %v1428_v47  ;;  %vm1434_vm1 = vweird.f32 %v1428_v47  ;;  %v1438_v48 = vand.u32 2147483647, %v1428_v47 }
 0x476   : > { %v1441_v13 = vor.u32 1.1754944e-38, %v1440_v6  ;;  %vm1439_vm3 = vcmp.eq.f32.partialorder %v1438_v48, 8.507059e+37 }
 0x477   : > { %v3045_v42 = vpop.eup %3044 }
 0x478   : > { %v1408_v26 = vadd.f32 1.0, %v3045_v42 }
 0x47a   : > { %3048 = vrcp.f32 %v1408_v26  ;;  %v3047_v50 = vpop.eup %3046  ;;  %v1420_v32 = vand.u32 2147483648, %v1408_v26  ;;  %v1418_v37 = vand.u32 2147483647, %v1408_v26  ;;  %vm1414_vm12 = vweird.f32 %v1408_v26 }
 0x47b   : > { %v1430_v45 = vmul.f32 %v3047_v50, %v1428_v47  ;;  %vm1435_vm15 = vweird.f32 %v3047_v50 }
 0x47c   : > { %v1421_v43 = vor.u32 1.1754944e-38, %v1420_v32  ;;  %vm1419_vm14 = vcmp.eq.f32.partialorder %v1418_v37, 8.507059e+37  ;;  %vm1436_vm2 = vmor %vm1434_vm1, %vm1435_vm15 }
 0x47d   : > { %v1431_v30 = vsub.f32 1.0, %v1430_v45 }
 0x47f   : > { %v1432_v38 = vmul.f32 %v3047_v50, %v1431_v30 }
 0x480   : > { %v3049_v49 = vpop.eup %3048 }
 0x481   : > { %v1410_v29 = vmul.f32 %v3049_v49, %v1408_v26  ;;  %vm1415_vm11 = vweird.f32 %v3049_v49  ;;  %v1433_v3 = vadd.f32 %v3047_v50, %v1432_v38 }
 0x482   : > { %vm1416_vm13 = vmor %vm1414_vm12, %vm1415_vm11  ;;  %vm1847_vm12 = vcmask 1040384  }
 0x483   : > { %v1411_v52 = vsub.f32 1.0, %v1410_v29  ;;  %v1437_v11 = vsel %vm1436_vm2, %v3047_v50, %v1433_v3 }
 0x484   : > { %v1442_v14 = vsel %vm1439_vm3, %v1441_v13, %v1437_v11 }
 0x485   : > { %v1412_v60 = vmul.f32 %v3049_v49, %v1411_v52  ;;  %v1447_v15 = vsub.f32 1.0, %v1442_v14  ;;  %v1449_v18 = vmul.f32 %v1442_v14, %v3791_v27 }
 0x487   : > { %v1413_v41 = vadd.f32 %v3049_v49, %v1412_v60 }
 0x489   : > { %v1417_v55 = vsel %vm1416_vm13, %v3049_v49, %v1413_v41  ;;  %vm1856_vm13 = vcmask 1041408  }
 0x48a   : > { %v1422_v4 = vsel %vm1419_vm14, %v1421_v43, %v1417_v55  ;;  %v766_v43 = vadd.f32 %v3749_v1, %v3655_v22  ;;  %vm1865_vm14 = vcmask 1042432  }
 0x48b   : > { %v1444_v8 = vmul.f32 %v1422_v4, %v1402_v54 }
 0x48d   : > { %v1445_v10 = vadd.f32 %v1444_v8, %v763_v5 }
 0x48f   : > { %3050 = vtanh.f32 %v1445_v10 }
 0x495   : > { %v3051_v16 = vpop.eup %3050 }
 0x496   : > { %v1448_v59 = vmul.f32 %v3051_v16, %v1447_v15  ;;  %v710_v15 = vadd.f32 %v3651_v12, %v3635_v56  ;;  %v1735_v56 = vperm.slane %v3696_v28, 0  ;;  %v1688_v12 = vrot.slane %v3696_v28, 4 }
 0x498   : > { %v3813_v21 = vadd.f32 %v1449_v18, %v1448_v59 }
 0x49a   : > { %2853 = vmatmul.msk.f32.vlgmr.msra.gmra.mxu2 %vm670_vm0, %v3813_v21  ;;  %2854 = vmatmul.msk.f32.vlgmr.msrb.gmra.mxu3 %vm670_vm0, %v3813_v21 }
 0x49b   : > { %2855 = vmatmul.msk.f32.vlgmr.msra.gmra.mxu0 %vm670_vm0, %v3813_v21 }
 0x518   : > { %v1511_v30 = vpop.f32.mrf.mxu0 }
 0x519   : > { %v1512_v37 = vadd.f32 %v1511_v30, %v3653_v17 }
 0x51d   : > { %v1471_v63 = vpop.f32.mrf.mxu2  ;;  %v1491_v34 = vpop.f32.mrf.mxu3 }
 0x51e   : > { %v1472_v35 = vadd.f32 %v1471_v63, %v3637_v57  ;;  %v1492_v31 = vadd.f32 %v1491_v34, %v3645_v2  ;;  %v739_v63 = vadd.f32 %v3627_v53, %v3643_v0  ;;  %v1689_v53 = vrot.slane %v3696_v28, 5 }
 0x520   : > { %v1514_v24 = vadd.f32 %v1472_v35, %v708_v61  ;;  %v1534_v36 = vadd.f32 %v1492_v31, %v737_v20  ;;  %v1671_v20 = vrot.slane %v3660_v9, 1  ;;  %v1685_v61 = vrot.slane %v3696_v28, 1 }
 0x521   : > { %v1672_v31 = vrot.slane %v3660_v9, 2 }
 0x522   : > { %v2856_v62 = vmul.f32 -1.442695, %v1514_v24  ;;  %v2857_v25 = vmul.f32 -1.442695, %v1534_v36  ;;  %v1686_v24 = vrot.slane %v3696_v28, 2  ;;  %v1673_v36 = vrot.slane %v3660_v9, 3 }
 0x524   : > { %3052 = vpow2.f32 %v2856_v62  ;;  %v1674_v62 = vrot.slane %v3660_v9, 4 }
 0x525   : > { %3054 = vpow2.f32 %v2857_v25  ;;  %v1736_v25 = vperm.slane %v1685_v61, 0 }
 0x52a   : > { %v3053_v39 = vpop.eup %3052 }
 0x52b   : > { %v3055_v44 = vpop.eup %3054  ;;  %v1518_v33 = vadd.f32 1.0, %v3053_v39  ;;  %v1690_v39 = vrot.slane %v3696_v28, 6 }
 0x52c   : > { %v1538_v46 = vadd.f32 1.0, %v3055_v44  ;;  %v1691_v44 = vrot.slane %v3696_v28, 7 }
 0x52d   : > { %3056 = vrcp.f32 %v1518_v33  ;;  %v1530_v50 = vand.u32 2147483648, %v1518_v33  ;;  %v1528_v29 = vand.u32 2147483647, %v1518_v33  ;;  %vm1524_vm5 = vweird.f32 %v1518_v33 }
 0x52e   : > { %3058 = vrcp.f32 %v1538_v46  ;;  %v1550_v55 = vand.u32 2147483648, %v1538_v46  ;;  %vm1544_vm9 = vweird.f32 %v1538_v46  ;;  %v1548_v3 = vand.u32 2147483647, %v1538_v46 }
 0x52f   : > { %v1531_v60 = vor.u32 1.1754944e-38, %v1530_v50  ;;  %vm1529_vm7 = vcmp.eq.f32.partialorder %v1528_v29, 8.507059e+37  ;;  %v1740_v50 = vperm.slane %v1689_v53, 0  ;;  %v1694_v29 = vrot.slane %v3725_v58, 3 }
 0x530   : > { %v1551_v6 = vor.u32 1.1754944e-38, %v1550_v55  ;;  %vm1549_vm11 = vcmp.eq.f32.partialorder %v1548_v3, 8.507059e+37  ;;  %v1696_v55 = vrot.slane %v3725_v58, 5  ;;  %v1702_v53 = vrot.slane %v3761_v19, 4 }
 0x533   : > { %v3057_v51 = vpop.eup %3056 }
 0x534   : > { %v3059_v47 = vpop.eup %3058  ;;  %v1520_v42 = vmul.f32 %v3057_v51, %v1518_v33  ;;  %vm1525_vm4 = vweird.f32 %v3057_v51 }
 0x535   : > { %v1540_v7 = vmul.f32 %v3059_v47, %v1538_v46  ;;  %vm1526_vm6 = vmor %vm1524_vm5, %vm1525_vm4  ;;  %vm1545_vm8 = vweird.f32 %v3059_v47  ;;  %v1737_v46 = vperm.slane %v1686_v24, 0  ;;  %vm1874_vm5 = vcmask 1043456  }
 0x536   : > { %v1521_v26 = vsub.f32 1.0, %v1520_v42  ;;  %vm1546_vm10 = vmor %vm1544_vm9, %vm1545_vm8  ;;  %v1848_v42 = vsel %vm1847_vm12, %v3660_v9, %v1735_v56  ;;  %vm1883_vm9 = vcmask 1044480  }
 0x537   : > { %v1541_v45 = vsub.f32 1.0, %v1540_v7 }
 0x538   : > { %v1522_v49 = vmul.f32 %v3057_v51, %v1521_v26  ;;  %v1739_v26 = vperm.slane %v1688_v12, 0  ;;  %v3921_v12 = vld [vmem:[%s3462_s28 + $0x30] sm:$0xff] }
 0x539   : > { %v1542_v52 = vmul.f32 %v3059_v47, %v1541_v45 }
 0x53a   : > { %v1523_v32 = vadd.f32 %v3057_v51, %v1522_v49  ;;  %v1692_v49 = vrot.slane %v3725_v58, 1 }
 0x53b   : > { %v1543_v41 = vadd.f32 %v3059_v47, %v1542_v52  ;;  %v3868_v52 = vld [vmem:[%s3462_s28] sm:$0xff] }
 0x53c   : > { %v1527_v38 = vsel %vm1526_vm6, %v3057_v51, %v1523_v32  ;;  %v1676_v51 = vrot.slane %v3660_v9, 6  ;;  %v3871_v32 = vld [vmem:[%s3462_s28 + $0x10] sm:$0xff]  ;;  %2863 = vmatpush.xpose.msk.msrb.mxu0 %vm670_vm0, %v3868_v52 }
 0x53d   : > { %v1532_v40 = vsel %vm1529_vm7, %v1531_v60, %v1527_v38  ;;  %v1547_v5 = vsel %vm1546_vm10, %v3059_v47, %v1543_v41  ;;  %v1677_v47 = vrot.slane %v3660_v9, 7  ;;  %v3874_v60 = vld [vmem:[%s3462_s28 + $0x8] sm:$0xff]  ;;  %v1742_v38 = vperm.slane %v1691_v44, 0  ;;  %2867 = vmatpush.xpose.msk.msra.mxu2 %vm670_vm0, %v3871_v32 }
 0x53e   : > { %v1554_v54 = vmul.f32 %v1532_v40, %v1512_v37  ;;  %v1552_v8 = vsel %vm1549_vm11, %v1551_v6, %v1547_v5  ;;  %v1741_v37 = vperm.slane %v1690_v39, 0  ;;  %v3882_v40 = vld [vmem:[%s3462_s28 + $0x18] sm:$0xff]  ;;  %v1751_v41 = vperm.slane %v3725_v58, 0  ;;  %2865 = vmatpush.xpose.msk.msrb.mxu1 %vm670_vm0, %v3874_v60 }
 0x53f   : > { %v1557_v48 = vsub.f32 1.0, %v1552_v8  ;;  %v1559_v13 = vmul.f32 %v1552_v8, %v3813_v21  ;;  %2869 = vmatpush.xpose.msk.msrb.mxu3 %vm670_vm0, %v3882_v40  ;;  %v1752_v5 = vperm.slane %v1692_v49, 0  ;;  %v1754_v8 = vperm.slane %v1694_v29, 0 }
 0x540   : > { %v1555_v4 = vadd.f32 %v1554_v54, %v766_v43  ;;  %v1850_v43 = vsel %vm1847_vm12, %v1672_v31, %v1737_v46  ;;  %v1695_v54 = vrot.slane %v3725_v58, 4  ;;  %v1701_v31 = vrot.slane %v3761_v19, 3 }
 0x541   : > { %vm1892_vm10 = vcmask 1045504   ;;  %vm1901_vm11 = vcmask 1046528  }
 0x542   : > { %3060 = vtanh.f32 %v1555_v4  ;;  %v1697_v4 = vrot.slane %v3725_v58, 6 }
 0x548   : > { %v3061_v10 = vpop.eup %3060 }
 0x549   : > { %v1558_v11 = vmul.f32 %v3061_v10, %v1557_v48  ;;  %v1852_v48 = vsel %vm1847_vm12, %v1674_v62, %v1739_v26  ;;  %v3898_v10 = vadd.f32 %v3751_v23, %v3655_v22  ;;  %v1699_v22 = vrot.slane %v3761_v19, 1 }
 0x54a   : > { %v1700_v23 = vrot.slane %v3761_v19, 2 }
 0x54b   : > { %v3831_v14 = vadd.f32 %v1559_v13, %v1558_v11  ;;  %v1854_v13 = vsel %vm1847_vm12, %v1676_v51, %v1741_v37  ;;  %v1768_v46 = vperm.slane %v1699_v22, 0 }
 0x54c   : > { %v1769_v51 = vperm.slane %v1700_v23, 0 }
 0x54d   : > { %2858 = vmatmul.msk.f32.vlgmr.msra.gmra.mxu1 %vm670_vm0, %v3831_v14  ;;  %2859 = vmatmul.msk.f32.vlgmr.msrb.gmra.mxu2 %vm670_vm0, %v3831_v14 }
 0x54e   : > { %2860 = vmatmul.msk.f32.vlgmr.msra.gmra.mxu3 %vm670_vm0, %v3831_v14  ;;  %2875 = vmatpush.xpose.msk.msrb.mxu2 %vm670_vm0, %v3921_v12 }
 0x5ca   : > { %v1581_v1 = vpop.f32.mrf.mxu1 }
 0x5cb   : > { %v1582_v16 = vadd.f32 %v1581_v1, %v3637_v57  ;;  %v1687_v57 = vrot.slane %v3696_v28, 3  ;;  %v1693_v28 = vrot.slane %v3725_v58, 2  ;;  %v1855_v1 = vsel %vm1847_vm12, %v1677_v47, %v1742_v38 }
 0x5cc   : > { %v1705_v47 = vrot.slane %v3761_v19, 7 }
 0x5cd   : > { %v1624_v18 = vadd.f32 %v1582_v16, %v710_v15  ;;  %v1738_v7 = vperm.slane %v1687_v57, 0  ;;  %v1753_v6 = vperm.slane %v1693_v28, 0  ;;  %v1857_v16 = vsel %vm1856_vm13, %v1848_v42, %v1751_v41  ;;  %v3918_v57 = vld [vmem:[%s3462_s28 + $0x28] sm:$0xff] }
 0x5ce   : > { %2873 = vmatpush.xpose.msk.msra.mxu1 %vm670_vm0, %v3918_v57 }
 0x5cf   : > { %v2861_v59 = vmul.f32 -1.442695, %v1624_v18  ;;  %v1851_v3 = vsel %vm1847_vm12, %v1673_v36, %v1738_v7  ;;  %v1755_v18 = vperm.slane %v1695_v54, 0  ;;  %v1704_v36 = vrot.slane %v3761_v19, 6 }
 0x5d0   : > { %v1601_v34 = vpop.f32.mrf.mxu2  ;;  %v1860_v24 = vsel %vm1856_vm13, %v1851_v3, %v1754_v8  ;;  %v1770_v7 = vperm.slane %v1701_v31, 0 }
 0x5d1   : > { %3062 = vpow2.f32 %v2861_v59  ;;  %v1602_v35 = vadd.f32 %v1601_v34, %v3645_v2  ;;  %v1675_v2 = vrot.slane %v3660_v9, 5  ;;  %v1849_v9 = vsel %vm1847_vm12, %v1671_v20, %v1736_v25  ;;  %v3932_v25 = vld [vmem:[%s3462_s28 + $0x38] sm:$0xff]  ;;  %v1621_v41 = vpop.f32.mrf.mxu3 }
 0x5d2   : > { %v1756_v59 = vperm.slane %v1696_v55, 0  ;;  %v1757_v20 = vperm.slane %v1697_v4, 0  ;;  %v1858_v61 = vsel %vm1856_vm13, %v1849_v9, %v1752_v5  ;;  %2877 = vmatpush.xpose.msk.msra.mxu3 %vm670_vm0, %v3932_v25  ;;  %v1773_v28 = vperm.slane %v1704_v36, 0 }
 0x5d3   : > { %v1644_v0 = vadd.f32 %v1602_v35, %v739_v63  ;;  %v1853_v11 = vsel %vm1847_vm12, %v1675_v2, %v1740_v50  ;;  %v1698_v63 = vrot.slane %v3725_v58, 7  ;;  %v1859_v35 = vsel %vm1856_vm13, %v1850_v43, %v1753_v6  ;;  %v3915_v58 = vld [vmem:[%s3462_s28 + $0x20] sm:$0xff]  ;;  %s2785_s28 = sshll.u32 %s4204_s19, 3 }
 0x5d4   : > { %2871 = vmatpush.xpose.msk.msra.mxu0 %vm670_vm0, %v3915_v58  ;;  %v1861_v2 = vsel %vm1856_vm13, %v1852_v48, %v1755_v18  ;;  %v1862_v39 = vsel %vm1856_vm13, %v1853_v11, %v1756_v59  ;;  %v1863_v26 = vsel %vm1856_vm13, %v1854_v13, %v1757_v20  ;;  %v1867_v43 = vsel %vm1865_vm14, %v1858_v61, %v1768_v46  ;;  %s4083_s15 = scalar_lea.vmem %s4174_s3, %s2785_s28 }
 0x5d5   : > { %v2862_v33 = vmul.f32 -1.442695, %v1644_v0  ;;  %v1703_v0 = vrot.slane %v3761_v19, 5  ;;  %v1758_v44 = vperm.slane %v1698_v63, 0  ;;  %v1868_v54 = vsel %vm1865_vm14, %v1859_v35, %v1769_v51 }
 0x5d6   : > { %v1774_v55 = vperm.slane %v1705_v47, 0  ;;  %v1869_v5 = vsel %vm1865_vm14, %v1860_v24, %v1770_v7  ;;  %v3959_v11 = vsel %vm1865_vm14, %v1863_v26, %v1773_v28  ;;  %v1707_v18 = vrot.slane %v3791_v27, 2 }
 0x5d7   : > { %v3063_v45 = vpop.eup %3062  ;;  %3064 = vpow2.f32 %v2862_v33  ;;  %v1767_v33 = vperm.slane %v3761_v19, 0  ;;  %v1772_v49 = vperm.slane %v1703_v0, 0  ;;  %v1864_v37 = vsel %vm1856_vm13, %v1855_v1, %v1758_v44 }
 0x5d8   : > { %v3865_v30 = vadd.f32 1.0, %v3063_v45  ;;  %v1771_v45 = vperm.slane %v1702_v53, 0  ;;  %v1622_v1 = vadd.f32 %v1621_v41, %v3653_v17  ;;  %v3965_v59 = vsel %vm1865_vm14, %v1864_v37, %v1774_v55 }
 0x5d9   : > { %v1866_v19 = vsel %vm1865_vm14, %v1857_v16, %v1767_v33  ;;  %v3956_v48 = vsel %vm1865_vm14, %v1862_v39, %v1772_v49  ;;  %v1783_v61 = vperm.slane %v3791_v27, 0  ;;  %v1708_v17 = vrot.slane %v3791_v27, 3 }
 0x5da   : > { %3066 = vrcp.f32 %v3865_v30  ;;  %v1640_v50 = vand.u32 2147483648, %v3865_v30  ;;  %v1638_v9 = vand.u32 2147483647, %v3865_v30  ;;  %vm1634_vm1 = vweird.f32 %v3865_v30 }
 0x5db   : > { %v3953_v8 = vsel %vm1865_vm14, %v1861_v2, %v1771_v45  ;;  %v1709_v24 = vrot.slane %v3791_v27, 4  ;;  %v1714_v0 = vrot.slane %v3813_v21, 2  ;;  %v1785_v36 = vperm.slane %v1707_v18, 0 }
 0x5dc   : > { %v1641_v6 = vor.u32 1.1754944e-38, %v1640_v50  ;;  %vm1639_vm3 = vcmp.eq.f32.partialorder %v1638_v9, 8.507059e+37  ;;  %v1715_v39 = vrot.slane %v3813_v21, 3  ;;  %v1786_v44 = vperm.slane %v1708_v17, 0 }
 0x5dd   : > { %v3065_v15 = vpop.eup %3064  ;;  %v1875_v46 = vsel %vm1874_vm5, %v1866_v19, %v1783_v61  ;;  %v3980_v51 = vperm.slane %v1709_v24, 0  ;;  %v1712_v47 = vrot.slane %v3791_v27, 7  ;;  %v1877_v26 = vsel %vm1874_vm5, %v1868_v54, %v1785_v36 }
 0x5de   : > { %v3905_v34 = vadd.f32 1.0, %v3065_v15  ;;  %v1716_v50 = vrot.slane %v3813_v21, 4  ;;  %v1801_v49 = vperm.slane %v1714_v0, 0  ;;  %v1802_v28 = vperm.slane %v1715_v39, 0 }
 0x5df   : > { %v1878_v9 = vsel %vm1874_vm5, %v1869_v5, %v1786_v44  ;;  %v1717_v37 = vrot.slane %v3813_v21, 5  ;;  %v1720_v19 = vrot.slane %v3831_v14, 1  ;;  %v1722_v54 = vrot.slane %v3831_v14, 3 }
 0x5e0   : > { %v3067_v56 = vpop.eup %3066  ;;  %3068 = vrcp.f32 %v3905_v34  ;;  %v1660_v22 = vand.u32 2147483648, %v3905_v34  ;;  %v1658_v20 = vand.u32 2147483647, %v3905_v34  ;;  %vm1654_vm6 = vweird.f32 %v3905_v34 }
 0x5e1   : > { %v1630_v62 = vmul.f32 %v3067_v56, %v3865_v30  ;;  %vm1635_vm15 = vweird.f32 %v3067_v56  ;;  %v1706_v30 = vrot.slane %v3791_v27, 1  ;;  %v1719_v55 = vrot.slane %v3813_v21, 7 }
 0x5e2   : > { %vm1636_vm2 = vmor %vm1634_vm1, %vm1635_vm15  ;;  %vm1659_vm8 = vcmp.eq.f32.partialorder %v1658_v20, 8.507059e+37  ;;  %v1815_v5 = vperm.slane %v3831_v14, 0  ;;  %v1723_v18 = vrot.slane %v3831_v14, 4  ;;  %vm2150_vm13 = vcmask 64512  }
 0x5e3   : > { %v1631_v42 = vsub.f32 1.0, %v1630_v62  ;;  %v1784_v53 = vperm.slane %v1706_v30, 0  ;;  %v1661_v62 = vor.u32 1.1754944e-38, %v1660_v22 }
 0x5e5   : > { %v1632_v29 = vmul.f32 %v3067_v56, %v1631_v42  ;;  %v1799_v42 = vperm.slane %v3813_v21, 0  ;;  %v1876_v7 = vsel %vm1874_vm5, %v1867_v43, %v1784_v53  ;;  %v1721_v43 = vrot.slane %v3831_v14, 2 }
 0x5e6   : > { %v3069_v38 = vpop.eup %3068  ;;  %v1726_v53 = vrot.slane %v3831_v14, 7 }
 0x5e7   : > { %v1650_v3 = vmul.f32 %v3069_v38, %v3905_v34  ;;  %v1633_v4 = vadd.f32 %v3067_v56, %v1632_v29  ;;  %vm1655_vm4 = vweird.f32 %v3069_v38  ;;  %v1710_v34 = vrot.slane %v3791_v27, 5 }
 0x5e8   : > { %vm1656_vm7 = vmor %vm1654_vm6, %vm1655_vm4  ;;  %v1817_v22 = vperm.slane %v1721_v43, 0  ;;  %vm2614_vm6 = vcmask 1041409  }
 0x5e9   : > { %v1651_v13 = vsub.f32 1.0, %v1650_v3  ;;  %v1637_v15 = vsel %vm1636_vm2, %v3067_v56, %v1633_v4  ;;  %v1713_v56 = vrot.slane %v3813_v21, 1 }
 0x5ea   : > { %v1642_v16 = vsel %vm1639_vm3, %v1641_v6, %v1637_v15  ;;  %v1884_v6 = vsel %vm1883_vm9, %v1875_v46, %v1799_v42  ;;  %v1886_v15 = vsel %vm1883_vm9, %v1877_v26, %v1801_v49 }
 0x5eb   : > { %v1652_v63 = vmul.f32 %v3069_v38, %v1651_v13  ;;  %v1664_v23 = vmul.f32 %v1642_v16, %v1622_v1  ;;  %v1800_v45 = vperm.slane %v1713_v56, 0  ;;  %v1803_v13 = vperm.slane %v1716_v50, 0 }
 0x5ec   : > { %v1887_v16 = vsel %vm1883_vm9, %v1878_v9, %v1802_v28  ;;  %v1725_v56 = vrot.slane %v3831_v14, 6  ;;  %v1895_v44 = vsel %vm1892_vm10, %v1886_v15, %v1817_v22  ;;  %v1819_v50 = vperm.slane %v1723_v18, 0 }
 0x5ed   : > { %v1653_v35 = vadd.f32 %v3069_v38, %v1652_v63  ;;  %v1665_v31 = vadd.f32 %v1664_v23, %v3898_v10  ;;  %v1711_v10 = vrot.slane %v3791_v27, 6  ;;  %v1885_v1 = vsel %vm1883_vm9, %v1876_v7, %v1800_v45 }
 0x5ee   : > { %v1816_v63 = vperm.slane %v1720_v19, 0  ;;  %v1818_v23 = vperm.slane %v1722_v54, 0  ;;  %v1788_v45 = vperm.slane %v1710_v34, 0  ;;  %v1804_v9 = vperm.slane %v1717_v37, 0 }
 0x5ef   : > { %v1657_v2 = vsel %vm1656_vm7, %v3069_v38, %v1653_v35  ;;  %3070 = vtanh.f32 %v1665_v31  ;;  %v1718_v38 = vrot.slane %v3813_v21, 6  ;;  %v1724_v21 = vrot.slane %v3831_v14, 5 }
 0x5f0   : > { %v1662_v33 = vsel %vm1659_vm8, %v1661_v62, %v1657_v2  ;;  %v1893_v31 = vsel %vm1892_vm10, %v1884_v6, %v1815_v5  ;;  %v1894_v39 = vsel %vm1892_vm10, %v1885_v1, %v1816_v63  ;;  %v1789_v49 = vperm.slane %v1711_v10, 0  ;;  %v2127_v1 = vld [vmem:[%s4083_s15 + $0x8] sm:$0xff] }
 0x5f1   : > { %v1667_v29 = vsub.f32 1.0, %v1662_v33  ;;  %v1669_v4 = vmul.f32 %v1662_v33, %v3831_v14  ;;  %v1896_v33 = vsel %vm1892_vm10, %v1887_v16, %v1818_v23  ;;  %v1879_v19 = vsel %vm1874_vm5, %v3953_v8, %v3980_v51  ;;  %v2128_v16 = vld [vmem:[%s4083_s15 + $0x10] sm:$0xff]  ;;  %v2129_v23 = vld [vmem:[%s4083_s15 + $0x18] sm:$0xff] }
 0x5f2   : > { %v1820_v34 = vperm.slane %v1724_v21, 0  ;;  %v1821_v43 = vperm.slane %v1725_v56, 0  ;;  %v1806_v54 = vperm.slane %v1719_v55, 0  ;;  %v1888_v10 = vsel %vm1883_vm9, %v1879_v19, %v1803_v13  ;;  %v2132_v56 = vld [vmem:[%s4083_s15 + $0x30] sm:$0xff] }
 0x5f3   : > { %v1897_v27 = vsel %vm1892_vm10, %v1888_v10, %v1819_v50  ;;  %v1881_v8 = vsel %vm1874_vm5, %v3959_v11, %v1789_v49  ;;  %vm2135_vm14 = vcmp.gt.f32.partialorder %v2127_v1, 0.5  ;;  %vm2136_vm15 = vcmp.gt.f32.partialorder %v2128_v16, 0.5 }
 0x5f4   : > { %vm2137_vm2 = vcmp.gt.f32.partialorder %v2129_v23, 0.5  ;;  %vm2140_vm4 = vcmp.gt.f32.partialorder %v2132_v56, 0.5  ;;  %v2430_v56 = vld [vmem:[#allocation9 + $0x18] sm:$0xff]  ;;  %vm2618_vm7 = vcmask 1043459   ;;  %vm2620_vm8 = vcmask 1044484  }
 0x5f5   : > { %v3071_v41 = vpop.eup %3070 }
 0x5f6   : > { %v1668_v3 = vmul.f32 %v3071_v41, %v1667_v29  ;;  %v1790_v41 = vperm.slane %v1712_v47, 0 }
 0x5f8   : > { %v1670_v30 = vadd.f32 %v1669_v4, %v1668_v3  ;;  %v1822_v3 = vperm.slane %v1726_v53, 0  ;;  %v1882_v55 = vsel %vm1874_vm5, %v3965_v59, %v1790_v41 }
 0x5f9   : > { %v1891_v11 = vsel %vm1883_vm9, %v1882_v55, %v1806_v54 }
 0x5fa   : > { %v1831_v20 = vperm.slane %v1670_v30, 0  ;;  %v1728_v61 = vrot.slane %v1670_v30, 1  ;;  %v1729_v17 = vrot.slane %v1670_v30, 2  ;;  %v1730_v35 = vrot.slane %v1670_v30, 3 }
 0x5fb   : > { %v1731_v24 = vrot.slane %v1670_v30, 4  ;;  %v1732_v46 = vrot.slane %v1670_v30, 5  ;;  %v1733_v26 = vrot.slane %v1670_v30, 6  ;;  %v1734_v28 = vrot.slane %v1670_v30, 7  ;;  %v2130_v30 = vld [vmem:[%s4083_s15 + $0x20] sm:$0xff] }
 0x5fc   : > { %v4006_v0 = vsel %vm1901_vm11, %v1893_v31, %v1831_v20  ;;  %v1832_v36 = vperm.slane %v1728_v61, 0  ;;  %v1833_v62 = vperm.slane %v1729_v17, 0  ;;  %v1834_v2 = vperm.slane %v1730_v35, 0  ;;  %v2131_v61 = vld [vmem:[%s4083_s15 + $0x28] sm:$0xff] }
 0x5fd   : > { %2864 = vmatmul.msk.f32.vlgmr.msrb.gmra.mxu0 %vm670_vm0, %v4006_v0  ;;  %v1835_v29 = vperm.slane %v1731_v24, 0  ;;  %v1836_v37 = vperm.slane %v1732_v46, 0  ;;  %v1838_v51 = vperm.slane %v1734_v28, 0  ;;  %v1900_v5 = vsel %vm1892_vm10, %v1891_v11, %v1822_v3 }
 0x5fe   : > { %v4014_v42 = vsel %vm1901_vm11, %v1894_v39, %v1832_v36  ;;  %v4017_v14 = vsel %vm1901_vm11, %v1895_v44, %v1833_v62  ;;  %v4020_v7 = vsel %vm1901_vm11, %v1896_v33, %v1834_v2  ;;  %2257 = vmatpush.msrb.mxu0 %v3868_v52  ;;  %v1805_v52 = vperm.slane %v1718_v38, 0  ;;  %v2133_v44 = vld [vmem:[%s4083_s15 + $0x38] sm:$0xff] }
 0x5ff   : > { %2866 = vmatmul.msk.f32.vlgmr.msrb.gmra.mxu1 %vm670_vm0, %v4014_v42  ;;  %2868 = vmatmul.msk.f32.vlgmr.msra.gmra.mxu2 %vm670_vm0, %v4017_v14  ;;  %v1837_v38 = vperm.slane %v1733_v26, 0  ;;  %v4048_v47 = vsel %vm1901_vm11, %v1897_v27, %v1835_v29  ;;  %v4072_v59 = vsel %vm1901_vm11, %v1900_v5, %v1838_v51  ;;  %vm2138_vm1 = vcmp.gt.f32.partialorder %v2130_v30, 0.5 }
 0x600   : > { %2870 = vmatmul.msk.f32.vlgmr.msrb.gmra.mxu3 %vm670_vm0, %v4020_v7  ;;  %2280 = vmatpush.msrb.mxu1 %v3874_v60  ;;  %v1880_v60 = vsel %vm1874_vm5, %v3956_v48, %v1788_v45  ;;  %vm2139_vm3 = vcmp.gt.f32.partialorder %v2131_v61, 0.5  ;;  %vm2141_vm5 = vcmp.gt.f32.partialorder %v2133_v44, 0.5 }
 0x601   : > { %2303 = vmatpush.msra.mxu2 %v3871_v32  ;;  %2326 = vmatpush.msrb.mxu3 %v3882_v40  ;;  %v1889_v32 = vsel %vm1883_vm9, %v1880_v60, %v1804_v9  ;;  %v1890_v40 = vsel %vm1883_vm9, %v1881_v8, %v1805_v52  ;;  %vm2622_vm9 = vcmask 1045509  }
 0x602   : > { %v1898_v48 = vsel %vm1892_vm10, %v1889_v32, %v1820_v34  ;;  %v1899_v4 = vsel %vm1892_vm10, %v1890_v40, %v1821_v43  ;;  %vm2624_vm10 = vcmask 1046534  }
 0x603   : > { %v4060_v6 = vsel %vm1901_vm11, %v1898_v48, %v1836_v37  ;;  %v4063_v13 = vsel %vm1901_vm11, %v1899_v4, %v1837_v38  ;;  %vm2626_vm11 = vcmask 1047559  }
 0x605   : > { %2872 = vmatmul.msk.f32.vlgmr.msra.gmra.mxu0 %vm670_vm0, %v4048_v47 }
 0x606   : > { %2349 = vmatpush.msra.mxu0 %v3915_v58  ;;  %v2126_v58 = vld [vmem:[%s4083_s15] sm:$0xff] }
 0x607   : > { %2874 = vmatmul.msk.f32.vlgmr.msra.gmra.mxu1 %vm670_vm0, %v4060_v6  ;;  %2876 = vmatmul.msk.f32.vlgmr.msrb.gmra.mxu2 %vm670_vm0, %v4063_v13  ;;  %vm2134_vm12 = vcmp.gt.f32.partialorder %v2126_v58, 0.5 }
 0x608   : > { %2878 = vmatmul.msk.f32.vlgmr.msra.gmra.mxu3 %vm670_vm0, %v4072_v59  ;;  %2372 = vmatpush.msra.mxu1 %v3918_v57 }
 0x609   : > { %2395 = vmatpush.msrb.mxu2 %v3921_v12  ;;  %2418 = vmatpush.msra.mxu3 %v3932_v25 }
 0x67a   : > { %v1941_v57 = vpop.f32.mrf.mxu0 }
 0x67b   : > { %v2142_v12 = vsel %vm2134_vm12, %v1941_v57, -1e+09 }
 0x67c   : > { %v1967_v25 = vpop.f32.mrf.mxu1  ;;  %v2151_v15 = vsel %vm2150_vm13, %v2142_v12, -inf }
 0x67d   : > { %2152 = vmax.xlane.f32.xlu0 %v2151_v15  ;;  %v2143_v18 = vsel %vm2135_vm14, %v1967_v25, -1e+09 }
 0x67e   : > { %v2154_v24 = vsel %vm2150_vm13, %v2143_v18, -inf }
 0x682   : > { %v1993_v21 = vpop.f32.mrf.mxu2  ;;  %v2045_v63 = vpop.f32.mrf.mxu0 }
 0x683   : > { %v2144_v22 = vsel %vm2136_vm15, %v1993_v21, -1e+09  ;;  %v2146_v20 = vsel %vm2138_vm1, %v2045_v63, -1e+09  ;;  %v2019_v17 = vpop.f32.mrf.mxu3 }
 0x684   : > { %v2163_v35 = vsel %vm2150_vm13, %v2146_v20, -inf  ;;  %v2157_v31 = vsel %vm2150_vm13, %v2144_v22, -inf  ;;  %v2071_v53 = vpop.f32.mrf.mxu1  ;;  %v2145_v36 = vsel %vm2137_vm2, %v2019_v17, -1e+09 }
 0x685   : > { %2164 = vmax.xlane.f32.xlu2 %v2163_v35  ;;  %2158 = vmax.xlane.f32.xlu1 %v2157_v31  ;;  %v2147_v62 = vsel %vm2139_vm3, %v2071_v53, -1e+09  ;;  %v2160_v33 = vsel %vm2150_vm13, %v2145_v36, -inf }
 0x686   : > { %2155 = vmax.xlane.f32.xlu0 %v2154_v24  ;;  %v2166_v26 = vsel %vm2150_vm13, %v2147_v62, -inf }
 0x68a   : > { %v2097_v2 = vpop.f32.mrf.mxu2 }
 0x68b   : > { %v2148_v39 = vsel %vm2140_vm4, %v2097_v2, -1e+09  ;;  %v2123_v50 = vpop.f32.mrf.mxu3  ;;  %v2428_v2 = vld [vmem:[#allocation9 + $0x8] sm:$0xff] }
 0x68c   : > { %v2169_v46 = vsel %vm2150_vm13, %v2148_v39, -inf  ;;  %v2149_v45 = vsel %vm2141_vm5, %v2123_v50, -1e+09 }
 0x68d   : > { %2161 = vmax.xlane.f32.xlu1 %v2160_v33  ;;  %2167 = vmax.xlane.f32.xlu2 %v2166_v26  ;;  %v2172_v49 = vsel %vm2150_vm13, %v2149_v45, -inf }
 0x68e   : > { %2170 = vmax.xlane.f32.xlu0 %v2169_v46 }
 0x695   : > { %2173 = vmax.xlane.f32.xlu1 %v2172_v49 }
 0x6f0   : > { %v2153_v28 = vpop.xlane.xlu0 %2152 }
 0x6f1   : > { %v2175_v29 = vsub.f32 %v2142_v12, %v2153_v28 }
 0x6f3   : > { %v2183_v9 = vmul.f32 1.442695, %v2175_v29 }
 0x6f5   : > { %3072 = vpow2.f32 %v2183_v9 }
 0x6f8   : > { %v2165_v52 = vpop.xlane.xlu2 %2164  ;;  %v2159_v41 = vpop.xlane.xlu1 %2158 }
 0x6f9   : > { %v2177_v19 = vsub.f32 %v2144_v22, %v2159_v41  ;;  %v2156_v34 = vpop.xlane.xlu0 %2155  ;;  %v2179_v37 = vsub.f32 %v2146_v20, %v2165_v52 }
 0x6fa   : > { %v2176_v43 = vsub.f32 %v2143_v18, %v2156_v34 }
 0x6fb   : > { %v3073_v54 = vpop.eup %3072  ;;  %v2187_v10 = vmul.f32 1.442695, %v2177_v19  ;;  %v2191_v27 = vmul.f32 1.442695, %v2179_v37 }
 0x6fc   : > { %v2185_v38 = vmul.f32 1.442695, %v2176_v43  ;;  %v2199_v3 = vsel %vm2150_vm13, %v3073_v54, 0.0 }
 0x6fd   : > { %2200 = vadd.xlane.f32.xlu2 %v2199_v3  ;;  %3074 = vpow2.f32 %v2187_v10  ;;  %v2426_v3 = vld [vmem:[#allocation8 + $0x18] sm:$0xff] }
 0x6fe   : > { %3076 = vpow2.f32 %v2185_v38 }
 0x6ff   : > { %3078 = vpow2.f32 %v2191_v27  ;;  %v2425_v27 = vld [vmem:[#allocation8 + $0x10] sm:$0xff] }
 0x700   : > { %v2162_v60 = vpop.xlane.xlu1 %2161  ;;  %v2168_v8 = vpop.xlane.xlu2 %2167 }
 0x701   : > { %v2178_v51 = vsub.f32 %v2145_v36, %v2162_v60  ;;  %v2171_v32 = vpop.xlane.xlu0 %2170  ;;  %v2180_v40 = vsub.f32 %v2147_v62, %v2168_v8  ;;  %v2429_v62 = vld [vmem:[#allocation9 + $0x10] sm:$0xff]  ;;  %v2424_v60 = vld [vmem:[#allocation8 + $0x8] sm:$0xff]  ;;  %v2423_v8 = vld [vmem:[#allocation8] sm:$0xff] }
 0x702   : > { %v2181_v48 = vsub.f32 %v2148_v39, %v2171_v32  ;;  %v2427_v39 = vld [vmem:[#allocation9] sm:$0xff] }
 0x703   : > { %v2189_v55 = vmul.f32 1.442695, %v2178_v51  ;;  %v2193_v4 = vmul.f32 1.442695, %v2180_v40  ;;  %v3075_v11 = vpop.eup %3074 }
 0x704   : > { %v3077_v5 = vpop.eup %3076  ;;  %v2205_v58 = vsel %vm2150_vm13, %v3075_v11, 0.0  ;;  %v2195_v12 = vmul.f32 1.442695, %v2181_v48  ;;  %v2990_v48 = vld [vmem:[%s4181_s10] ss:$0 sm:$0xff] }
 0x705   : > { %3080 = vpow2.f32 %v2189_v55  ;;  %2206 = vadd.xlane.f32.xlu1 %v2205_v58  ;;  %v2202_v57 = vsel %vm2150_vm13, %v3077_v5, 0.0  ;;  %v3079_v15 = vpop.eup %3078 }
 0x706   : > { %3082 = vpow2.f32 %v2193_v4  ;;  %2203 = vadd.xlane.f32.xlu0 %v2202_v57  ;;  %v2211_v63 = vsel %vm2150_vm13, %v3079_v15, 0.0  ;;  %v3291_v4 = vmov 0  }
 0x707   : > { %3084 = vpow2.f32 %v2195_v12  ;;  %2988 = vset.pattern.permute.xlu1 %v3291_v4  ;;  %2989 = vset.pattern.permute.xlu0 %v3291_v4 }
 0x708   : > { %v2174_v25 = vpop.xlane.xlu1 %2173 }
 0x709   : > { %v2182_v1 = vsub.f32 %v2149_v45, %v2174_v25 }
 0x70b   : > { %v3081_v16 = vpop.eup %3080  ;;  %v2197_v30 = vmul.f32 1.442695, %v2182_v1 }
 0x70c   : > { %v2208_v18 = vsel %vm2150_vm13, %v3081_v16, 0.0  ;;  %v3083_v21 = vpop.eup %3082 }
 0x70d   : > { %3086 = vpow2.f32 %v2197_v30  ;;  %2209 = vadd.xlane.f32.xlu2 %v2208_v18  ;;  %v2214_v22 = vsel %vm2150_vm13, %v3083_v21, 0.0  ;;  %v3085_v23 = vpop.eup %3084 }
 0x70e   : > { %2212 = vadd.xlane.f32.xlu0 %v2211_v63  ;;  %2215 = vadd.xlane.f32.xlu1 %v2214_v22  ;;  %v2217_v17 = vsel %vm2150_vm13, %v3085_v23, 0.0 }
 0x713   : > { %v3087_v20 = vpop.eup %3086 }
 0x714   : > { %v2220_v61 = vsel %vm2150_vm13, %v3087_v20, 0.0 }
 0x715   : > { %2218 = vadd.xlane.f32.xlu2 %v2217_v17 }
 0x716   : > { %2221 = vadd.xlane.f32.xlu0 %v2220_v61 }
 0x770   : > { %v2201_v35 = vpop.xlane.xlu2 %2200 }
 0x771   : > { %3088 = vrcp.f32 %v2201_v35 }
 0x777   : > { %v3089_v31 = vpop.eup %3088 }
 0x778   : > { %v2231_v24 = vmul.f32 %v3089_v31, %v3073_v54  ;;  %v2207_v53 = vpop.xlane.xlu1 %2206  ;;  %v2991_v31 = vld [vmem:[#allocation2] ss:$0 sm:$0xff] }
 0x779   : > { %3090 = vrcp.f32 %v2207_v53  ;;  %v2204_v36 = vpop.xlane.xlu0 %2203 }
 0x77a   : > { %2879 = vmatmul.msk.f32.vlgmr.msrb.gmra.mxu0 %vm2150_vm13, %v2231_v24  ;;  %3092 = vrcp.f32 %v2204_v36 }
 0x77b   : > { %2443 = vmatpush.msrb.mxu0 %v2430_v56 }
 0x77d   : > { %2444 = vmatpush.msrb.mxu0 %v2429_v62 }
 0x77f   : > { %2445 = vmatpush.msrb.mxu0 %v2428_v2  ;;  %v3091_v44 = vpop.eup %3090 }
 0x780   : > { %v2210_v33 = vpop.xlane.xlu2 %2209  ;;  %v3093_v46 = vpop.eup %3092  ;;  %v2233_v26 = vmul.f32 %v3091_v44, %v3075_v11 }
 0x781   : > { %3094 = vrcp.f32 %v2210_v33  ;;  %2446 = vmatpush.msrb.mxu0 %v2427_v39  ;;  %v2232_v50 = vmul.f32 %v3093_v46, %v3077_v5  ;;  %v2213_v45 = vpop.xlane.xlu0 %2212  ;;  %v2216_v49 = vpop.xlane.xlu1 %2215 }
 0x782   : > { %3096 = vrcp.f32 %v2213_v45  ;;  %2881 = vmatmul.msk.f32.vlgmr.msra.gmra.mxu2 %vm2150_vm13, %v2233_v26 }
 0x783   : > { %3098 = vrcp.f32 %v2216_v49  ;;  %2880 = vmatmul.msk.f32.vlgmr.msrb.gmra.mxu1 %vm2150_vm13, %v2232_v50 }
 0x784   : > { %2508 = vmatpush.msrb.mxu1 %v2426_v3 }
 0x786   : > { %2509 = vmatpush.msrb.mxu1 %v2425_v27 }
 0x787   : > { %v3095_v28 = vpop.eup %3094 }
 0x788   : > { %v2234_v29 = vmul.f32 %v3095_v28, %v3081_v16  ;;  %v2219_v9 = vpop.xlane.xlu2 %2218  ;;  %v3097_v52 = vpop.eup %3096  ;;  %2510 = vmatpush.msrb.mxu1 %v2424_v60  ;;  %v2604_v60 = vlaneseq }
 0x789   : > { %3100 = vrcp.f32 %v2219_v9  ;;  %v3099_v41 = vpop.eup %3098  ;;  %v2235_v19 = vmul.f32 %v3097_v52, %v3079_v15  ;;  %v2222_v34 = vpop.xlane.xlu0 %2221 }
 0x78a   : > { %2882 = vmatmul.msk.f32.vlgmr.msrb.gmra.mxu3 %vm2150_vm13, %v2234_v29  ;;  %v2236_v43 = vmul.f32 %v3099_v41, %v3083_v21  ;;  %3102 = vrcp.f32 %v2222_v34  ;;  %2511 = vmatpush.msrb.mxu1 %v2423_v8 }
 0x78b   : > { %2883 = vmatmul.msk.f32.vlgmr.msra.gmra.mxu0 %vm2150_vm13, %v2235_v19 }
 0x78c   : > { %2884 = vmatmul.msk.f32.vlgmr.msra.gmra.mxu1 %vm2150_vm13, %v2236_v43 }
 0x78f   : > { %v3101_v54 = vpop.eup %3100 }
 0x790   : > { %v2237_v10 = vmul.f32 %v3101_v54, %v3085_v23  ;;  %v3103_v37 = vpop.eup %3102 }
 0x791   : > { %v2238_v38 = vmul.f32 %v3103_v37, %v3087_v20 }
 0x792   : > { %2885 = vmatmul.msk.f32.vlgmr.msrb.gmra.mxu2 %vm2150_vm13, %v2237_v10 }
 0x793   : > { %2886 = vmatmul.msk.f32.vlgmr.msra.gmra.mxu3 %vm2150_vm13, %v2238_v38  ;;  %2887 = vmatmul.msk.f32.vlgmr.msrb.gmra.mxu0 %vm670_vm0, %v4006_v0 }
 0x79b   : > { %2888 = vmatmul.msk.f32.gmra.mxu0 %vm670_vm0, %v4014_v42 }
 0x7a3   : > { %2889 = vmatmul.msk.f32.gmra.mxu0 %vm670_vm0, %v4017_v14 }
 0x7ab   : > { %2890 = vmatmul.msk.f32.gmra.mxu0 %vm670_vm0, %v4020_v7 }
 0x7b3   : > { %2891 = vmatmul.msk.f32.gmra.mxu0 %vm670_vm0, %v4048_v47 }
 0x7bb   : > { %2892 = vmatmul.msk.f32.gmra.mxu0 %vm670_vm0, %v4060_v6 }
 0x7c3   : > { %2893 = vmatmul.msk.f32.gmra.mxu0 %vm670_vm0, %v4063_v13 }
 0x7cb   : > { %2894 = vmatmul.msk.f32.gmra.mxu0 %vm670_vm0, %v4072_v59 }
 0x7f7   : > { %v2259_v0 = vpop.f32.mrf.mxu0 }
 0x7f8   : > { %2895 = vmatmul.msk.f32.vlgmr.msrb.gmra.mxu1 %vm670_vm0, %v2259_v0 }
 0x800   : > { %v2282_v42 = vpop.f32.mrf.mxu1 }
 0x801   : > { %2896 = vmatmul.msk.f32.gmra.mxu1 %vm670_vm0, %v2282_v42 }
 0x805   : > { %v2305_v14 = vpop.f32.mrf.mxu2 }
 0x808   : > { %v2351_v47 = vpop.f32.mrf.mxu0 }
 0x809   : > { %2897 = vmatmul.msk.f32.gmra.mxu1 %vm670_vm0, %v2305_v14  ;;  %v2374_v6 = vpop.f32.mrf.mxu1 }
 0x80d   : > { %v2328_v7 = vpop.f32.mrf.mxu3 }
 0x810   : > { %v2448_v51 = vpop.f32.mrf.mxu0 }
 0x811   : > { %2898 = vmatmul.msk.f32.gmra.mxu1 %vm670_vm0, %v2328_v7 }
 0x815   : > { %v2397_v13 = vpop.f32.mrf.mxu2 }
 0x816   : > { %v2420_v59 = vpop.f32.mrf.mxu3 }
 0x818   : > { %v2451_v32 = vpop.f32.mrf.mxu0 }
 0x819   : > { %2899 = vmatmul.msk.f32.gmra.mxu1 %vm670_vm0, %v2351_v47  ;;  %v2605_v47 = vand.u32 127, %v2604_v60 }
 0x820   : > { %v2454_v11 = vpop.f32.mrf.mxu0 }
 0x821   : > { %2900 = vmatmul.msk.f32.gmra.mxu1 %vm670_vm0, %v2374_v6 }
 0x828   : > { %v2457_v1 = vpop.f32.mrf.mxu0 }
 0x829   : > { %2901 = vmatmul.msk.f32.gmra.mxu1 %vm670_vm0, %v2397_v13 }
 0x830   : > { %v2460_v20 = vpop.f32.mrf.mxu0 }
 0x831   : > { %2902 = vmatmul.msk.f32.gmra.mxu1 %vm670_vm0, %v2420_v59 }
 0x838   : > { %v2463_v36 = vpop.f32.mrf.mxu0 }
 0x840   : > { %v2466_v26 = vpop.f32.mrf.mxu0 }
 0x848   : > { %v2469_v9 = vpop.f32.mrf.mxu0 }
 0x875   : > { %v2513_v40 = vpop.f32.mrf.mxu1 }
 0x876   : > { %v2514_v55 = vadd.f32 %v2513_v40, %v2448_v51 }
 0x878   : > { %3104 = vtanh.f32 %v2514_v55 }
 0x87e   : > { %v3105_v5 = vpop.eup %3104  ;;  %v2516_v58 = vpop.f32.mrf.mxu1 }
 0x87f   : > { %v2549_v57 = vmul.f32 %v3105_v5, %v2990_v48  ;;  %v2517_v12 = vadd.f32 %v2516_v58, %v2451_v32 }
 0x881   : > { %v2557_v25 = vsel %vm670_vm0, %v2549_v57, 0.0  ;;  %3106 = vtanh.f32 %v2517_v12 }
 0x882   : > { %2558 = vadd.xlane.f32.xlu1 %v2557_v25 }
 0x886   : > { %v2519_v15 = vpop.f32.mrf.mxu1 }
 0x887   : > { %v3107_v16 = vpop.eup %3106  ;;  %v2520_v30 = vadd.f32 %v2519_v15, %v2454_v11 }
 0x888   : > { %v2550_v18 = vmul.f32 %v3107_v16, %v2990_v48 }
 0x889   : > { %3108 = vtanh.f32 %v2520_v30 }
 0x88a   : > { %v2560_v21 = vsel %vm670_vm0, %v2550_v18, 0.0 }
 0x88b   : > { %2561 = vadd.xlane.f32.xlu2 %v2560_v21 }
 0x88e   : > { %v2522_v63 = vpop.f32.mrf.mxu1 }
 0x88f   : > { %v3109_v22 = vpop.eup %3108  ;;  %v2523_v23 = vadd.f32 %v2522_v63, %v2457_v1 }
 0x890   : > { %v2551_v61 = vmul.f32 %v3109_v22, %v2990_v48 }
 0x891   : > { %3110 = vtanh.f32 %v2523_v23 }
 0x892   : > { %v2563_v17 = vsel %vm670_vm0, %v2551_v61, 0.0 }
 0x893   : > { %2564 = vadd.xlane.f32.xlu0 %v2563_v17 }
 0x896   : > { %v2525_v35 = vpop.f32.mrf.mxu1 }
 0x897   : > { %v3111_v24 = vpop.eup %3110  ;;  %v2526_v56 = vadd.f32 %v2525_v35, %v2460_v20 }
 0x898   : > { %v2552_v53 = vmul.f32 %v3111_v24, %v2990_v48 }
 0x899   : > { %3112 = vtanh.f32 %v2526_v56 }
 0x89a   : > { %v2566_v62 = vsel %vm670_vm0, %v2552_v53, 0.0 }
 0x89b   : > { %2585 = vperm.xlu1 %2988, %v2991_v31   ;;  %2567 = vadd.xlane.f32.xlu2 %v2566_v62 }
 0x89e   : > { %v2528_v2 = vpop.f32.mrf.mxu1 }
 0x89f   : > { %v3113_v39 = vpop.eup %3112  ;;  %v2529_v44 = vadd.f32 %v2528_v2, %v2463_v36 }
 0x8a0   : > { %v2553_v33 = vmul.f32 %v3113_v39, %v2990_v48 }
 0x8a1   : > { %3114 = vtanh.f32 %v2529_v44 }
 0x8a2   : > { %v2569_v46 = vsel %vm670_vm0, %v2553_v33, 0.0 }
 0x8a3   : > { %2570 = vadd.xlane.f32.xlu0 %v2569_v46 }
 0x8a6   : > { %v2531_v50 = vpop.f32.mrf.mxu1 }
 0x8a7   : > { %v3115_v45 = vpop.eup %3114  ;;  %v2532_v49 = vadd.f32 %v2531_v50, %v2466_v26 }
 0x8a8   : > { %v2554_v28 = vmul.f32 %v3115_v45, %v2990_v48 }
 0x8a9   : > { %3116 = vtanh.f32 %v2532_v49 }
 0x8aa   : > { %v2572_v29 = vsel %vm670_vm0, %v2554_v28, 0.0 }
 0x8ab   : > { %2573 = vadd.xlane.f32.xlu2 %v2572_v29 }
 0x8ae   : > { %v2534_v52 = vpop.f32.mrf.mxu1 }
 0x8af   : > { %v3117_v41 = vpop.eup %3116  ;;  %v2535_v19 = vadd.f32 %v2534_v52, %v2469_v9 }
 0x8b0   : > { %v2555_v34 = vmul.f32 %v3117_v41, %v2990_v48 }
 0x8b1   : > { %3118 = vtanh.f32 %v2535_v19 }
 0x8b2   : > { %v2575_v43 = vsel %vm670_vm0, %v2555_v34, 0.0 }
 0x8b3   : > { %2576 = vadd.xlane.f32.xlu0 %v2575_v43 }
 0x8b7   : > { %v3119_v54 = vpop.eup %3118 }
 0x8b8   : > { %v2556_v10 = vmul.f32 %v3119_v54, %v2990_v48 }
 0x8ba   : > { %v2578_v37 = vsel %vm670_vm0, %v2556_v10, 0.0  ;;  %vm2616_vm0 = vcmask 1042434  }
 0x8bb   : > { %2579 = vadd.xlane.f32.xlu2 %v2578_v37 }
 0x8f5   : > { %v2559_v38 = vpop.xlane.xlu1 %2558 }
 0x8fe   : > { %v2562_v3 = vpop.xlane.xlu2 %2561 }
 0x906   : > { %v2565_v27 = vpop.xlane.xlu0 %2564 }
 0x90d   : > { %v2586_v8 = vpop.permute.xlu1 %2585 }
 0x90e   : > { %v2568_v0 = vpop.xlane.xlu2 %2567  ;;  %v2588_v14 = vadd.f32 %v2586_v8, %v2559_v38  ;;  %v2589_v7 = vadd.f32 %v2586_v8, %v2562_v3  ;;  %v2590_v6 = vadd.f32 %v2586_v8, %v2565_v27 }
 0x90f   : > { %v2591_v4 = vadd.f32 %v2586_v8, %v2568_v0 }
 0x910   : > { %v2606_v13 = vperm.slane %v2588_v14, %v2605_v47  ;;  %v2607_v59 = vperm.slane %v2589_v7, %v2605_v47  ;;  %v2608_v40 = vperm.slane %v2590_v6, %v2605_v47 }
 0x911   : > { %v2609_v12 = vperm.slane %v2591_v4, %v2605_v47 }
 0x912   : > { %v2615_v48 = vsel %vm2614_vm6, %v2607_v59, %v2606_v13 }
 0x913   : > { %v2617_v58 = vsel %vm2616_vm0, %v2608_v40, %v2615_v48 }
 0x914   : > { %v2619_v16 = vsel %vm2618_vm7, %v2609_v12, %v2617_v58 }
 0x916   : > { %v2571_v42 = vpop.xlane.xlu0 %2570 }
 0x917   : > { %v2592_v55 = vadd.f32 %v2586_v8, %v2571_v42 }
 0x919   : > { %v2610_v57 = vperm.slane %v2592_v55, %v2605_v47 }
 0x91b   : > { %v2621_v18 = vsel %vm2620_vm8, %v2610_v57, %v2619_v16 }
 0x91e   : > { %v2574_v51 = vpop.xlane.xlu2 %2573 }
 0x91f   : > { %v2593_v11 = vadd.f32 %v2586_v8, %v2574_v51 }
 0x921   : > { %v2611_v25 = vperm.slane %v2593_v11, %v2605_v47 }
 0x923   : > { %v2623_v21 = vsel %vm2622_vm9, %v2611_v25, %v2621_v18 }
 0x926   : > { %v2577_v32 = vpop.xlane.xlu0 %2576 }
 0x927   : > { %v2594_v5 = vadd.f32 %v2586_v8, %v2577_v32 }
 0x929   : > { %v2612_v1 = vperm.slane %v2594_v5, %v2605_v47 }
 0x92b   : > { %v2625_v22 = vsel %vm2624_vm10, %v2612_v1, %v2623_v21 }
 0x92e   : > { %v2580_v15 = vpop.xlane.xlu2 %2579 }
 0x92f   : > { %v2595_v30 = vadd.f32 %v2586_v8, %v2580_v15 }
 0x931   : > { %v2613_v63 = vperm.slane %v2595_v30, %v2605_v47 }
 0x933   : > { %v2627_v23 = vsel %vm2626_vm11, %v2613_v63, %v2625_v22 }
 0x934   : > { %2629 = vst.msk [vmem:[%s608_s29] sm:$0xff] %vm2150_vm13, %v2627_v23 }
 0x935 PF: > { %s4198_s26 = sld [smem:[#allocation14_spill]]  ;;  %s4200_s23 = smov %s3272_s24 }
 0x936   : > { %s4199_s27 = sld [smem:[#allocation15_spill]]  ;;  %s4201_s24 = smov %s3276_s25 }
 0x93b   : > { %p26_p8 = scmp.ge.s32.totalorder %s4198_s26, 4  }
 0x93c   : > { %s4202_s25 = smov %s4199_s27 }
 0x93d   :  { %28 = sbr.rel (!%p26_p8) target bundleno = 9 (0x9), region = 172 }
 0x942   :  { %2649 = vsyncpa [#allocation5], 1 }
 0x943   :  { %2651 = vsyncpa [#allocation5 + $0x1], 1 }
 0x944   :  { %2652 = vsyncpa [#allocation7], 1 }
 0x945   :  { %2653 = vsyncpa [#allocation10], 1 }

</bundles_post_ra>
